<compile_context>
chip_gen: v6e
topology: v6e:2x2x1
jax: 0.10.0
libtpu: 0.0.40
codegen_flags: <defaults>
</compile_context>

<pallas_src>
import functools

import numpy as np
import jax
import jax.numpy as jnp
from jax.experimental import pallas as pl
from jax.experimental.pallas import tpu as pltpu

_HIGHEST = jax.lax.Precision.HIGHEST  # keep f32 accuracy for the tiny MXU matmuls


def _make_crf_kernel(seq_len, num_tags, batch_tile):
    S, T, TB = seq_len, num_tags, batch_tile

    def kernel(em_ref, tags_ref, mask_ref, tt_ref, sos_ref, eos_ref, out_ref):
        # em_ref:   (S, T, TB) f32   emissions, batch on lanes
        # tags_ref: (S, TB)    i32
        # mask_ref: (S, TB)    f32   contiguous valid prefix with mask[0] == 1
        #                            (same assumption as the PyTorch reference)
        # tt_ref:   (T, T)     f32   tt[c, p] = transition[p, c]
        # sos_ref:  (T, 1)     f32   transition[sos, :] as a column
        # eos_ref:  (T, 1)     f32   transition[:, eos] as a column
        em = em_ref[...]
        tags = tags_ref[...]
        mask = mask_ref[...]
        tt = tt_ref[...]
        sos_col = sos_ref[...]
        eos_col = eos_ref[...]

        # One-hot of every tag, batch on lanes: oh[s, t, b] = (tags[s, b] == t).
        tag_iota = jax.lax.broadcasted_iota(jnp.int32, (S, T, TB), 1)
        oh = (tag_iota == tags[:, None, :]).astype(jnp.float32)            # (S, T, TB)

        # ---------------- gold path (batched over seq_len) ----------------
        # emissions[b, s, tags[b, s]] for every step, in one shot.
        e_all = jnp.sum(em * oh, axis=1)                                   # (S, TB)

        # transition[sos, tags[:, 0]]
        t0 = jnp.sum(oh[0] * sos_col, axis=0, keepdims=True)               # (1, TB)
        gold = e_all[0:1, :] + t0                                          # (1, TB)

        # transition[last_valid_tag, eos] — vectorised last-tag selection.
        last_idx = jnp.sum(mask, axis=0, keepdims=True).astype(jnp.int32) - 1   # (1, TB)
        step_iota = jax.lax.broadcasted_iota(jnp.int32, (S, TB), 0)
        sel = (step_iota == last_idx).astype(jnp.float32)                  # (S, TB)
        last_oh = jnp.sum(oh * sel[:, None, :], axis=0)                    # (T, TB)
        gold = gold + jnp.sum(last_oh * eos_col, axis=0, keepdims=True)    # (1, TB)

        # -------- fused time loop: gold transitions + log-partition --------
        # exp(trans).T hoisted above the loop; -10000 entries flush to exactly 0.
        w = jnp.exp(tt)                                                    # (T, T)
        alphas = sos_col + em[0]                                           # (T, TB)

        # S is small and static here, so a full unroll is fine; for long
        # sequences switch to lax.fori_loop(..., unroll=4..8) slicing em_ref/
        # tags_ref per step instead of materializing the full (S, T, TB) block.
        for i in range(1, S):
            valid = mask[i:i + 1, :]                                       # (1, TB)
            oh_prev, oh_cur = oh[i - 1], oh[i]

            # gold: transition[tags[i-1], tags[i]] via one tiny MXU matmul.
            rows = jnp.dot(tt, oh_prev, precision=_HIGHEST,
                           preferred_element_type=jnp.float32)             # rows[c,b] = trans[prev_b, c]
            t_sc = jnp.sum(rows * oh_cur, axis=0, keepdims=True)           # (1, TB)
            gold = gold + (e_all[i:i + 1, :] + t_sc) * valid

            # partition: matrix-form logsumexp over previous tags on the MXU.
            m = jnp.max(alphas, axis=0, keepdims=True)                     # (1, TB)
            ea = jnp.exp(alphas - m)                                       # (T, TB)
            mat = jnp.dot(w, ea, precision=_HIGHEST,
                          preferred_element_type=jnp.float32)              # (T, TB)
            new_alphas = em[i] + m + jnp.log(mat)                          # (T, TB)
            # jnp.where, not is_valid*new + (1-is_valid)*old: log(0) = -inf is
            # legal here and an arithmetic blend would create 0 * inf = NaN.
            alphas = jnp.where(valid > 0.0, new_alphas, alphas)

        end = alphas + eos_col                                             # (T, TB)
        m = jnp.max(end, axis=0, keepdims=True)
        partition = m + jnp.log(jnp.sum(jnp.exp(end - m), axis=0, keepdims=True))  # (1, TB)

        # Lane-dense per-sequence NLL contribution.
        out_ref[...] = partition - gold

    return kernel


@functools.partial(jax.jit, static_argnames=("sos_tag", "eos_tag", "batch_tile"))
def linear_crf_nll(emissions, tags, mask, transition, *, sos_tag, eos_tag,
                   batch_tile=128):
    """Scalar NLL = -sum_b (gold_score_b - log_partition_b), as in LinearCRF.forward."""
    B, S, T = emissions.shape
    TB = int(batch_tile)
    num_blocks = -(-B // TB)
    B_pad = num_blocks * TB
    pad = B_pad - B

    em = jnp.pad(emissions.astype(jnp.float32), ((0, pad), (0, 0), (0, 0)))
    tg = jnp.pad(tags.astype(jnp.int32), ((0, pad), (0, 0)))
    mk = jnp.pad(mask.astype(jnp.float32), ((0, pad), (0, 0)))

    # Batch goes to the lane (minor) axis inside the kernel.
    em_t = jnp.transpose(em, (1, 2, 0))          # (S, T, B_pad)
    tags_t = jnp.transpose(tg, (1, 0))           # (S, B_pad)
    mask_t = jnp.transpose(mk, (1, 0))           # (S, B_pad)

    trans = transition.astype(jnp.float32)
    tt = jnp.transpose(trans)                    # tt[c, p] = transition[p, c]
    sos_col = trans[sos_tag, :].reshape(T, 1)    # transition[sos, :]
    eos_col = trans[:, eos_tag].reshape(T, 1)    # transition[:, eos]

    kernel = _make_crf_kernel(S, T, TB)

    cost = pl.CostEstimate(
        flops=4 * B_pad * S * T * T,             # two (T,T)x(T,TB) matmuls per step
        transcendentals=2 * B_pad * S * T,       # exp + log of (T, TB) per step
        bytes_accessed=4 * (em_t.size + mask_t.size + tags_t.size
                            + tt.size + 2 * T + B_pad))

    per_seq = pl.pallas_call(
        kernel,
        out_shape=jax.ShapeDtypeStruct((num_blocks, TB), jnp.float32),
        grid=(num_blocks,),
        in_specs=[
            pl.BlockSpec((S, T, TB), lambda b: (0, 0, b)),   # emissions (batch tiled on lanes)
            pl.BlockSpec((S, TB), lambda b: (0, b)),         # tags
            pl.BlockSpec((S, TB), lambda b: (0, b)),         # mask
            pl.BlockSpec((T, T), lambda b: (0, 0)),          # transition.T (resident)
            pl.BlockSpec((T, 1), lambda b: (0, 0)),          # sos column
            pl.BlockSpec((T, 1), lambda b: (0, 0)),          # eos column
        ],
        out_specs=pl.BlockSpec((1, TB), lambda b: (b, 0)),   # lane-dense per-sequence output
        compiler_params=pltpu.CompilerParams(
            dimension_semantics=("parallel",),
            vmem_limit_bytes=32 * 1024 * 1024),
        cost_estimate=cost,
    )(em_t, tags_t, mask_t, tt, sos_col, eos_col)

    # Drop padded lanes; sum over the batch (matches -torch.sum(scores - partition)).
    return jnp.sum(per_seq.reshape(-1)[:B])


def _reference_nll(emissions, tags, mask, transition, sos_tag, eos_tag):
    """Pure-JAX mirror of the PyTorch LinearCRF forward (for verification)."""
    B, S, T = emissions.shape
    barange = jnp.arange(B)

    # gold scores
    first = tags[:, 0]
    scores = transition[sos_tag, first] + emissions[barange, 0, first]
    for i in range(1, S):
        prev, cur = tags[:, i - 1], tags[:, i]
        e = emissions[barange, i, cur]
        t = transition[prev, cur]
        scores = scores + (e + t) * mask[:, i]
    last_idx = mask.sum(1).astype(jnp.int32) - 1
    last_tags = tags[barange, last_idx]
    scores = scores + transition[last_tags, eos_tag]

    # log partition
    alphas = transition[sos_tag][None, :] + emissions[:, 0]
    for i in range(1, S):
        sc = alphas[:, :, None] + transition[None, :, :] + emissions[:, i][:, None, :]
        new_alphas = jax.scipy.special.logsumexp(sc, axis=1)
        iv = mask[:, i][:, None]
        alphas = iv * new_alphas + (1.0 - iv) * alphas
    end = alphas + transition[:, eos_tag][None, :]
    partition = jax.scipy.special.logsumexp(end, axis=1)

    return -jnp.sum(scores - partition)


if __name__ == "__main__":
    # Small, deterministic setup consistent with the module's forward.
    num_tags = 6
    sos_tag, eos_tag = 4, 5
    batch, seq_len = 4, 8

    key = jax.random.PRNGKey(0)
    k_trans, k_em, k_tags = jax.random.split(key, 3)

    # nn.init.uniform_(transition, -0.1, 0.1); then column sos = -10000, row eos = -10000
    transition = jax.random.uniform(k_trans, (num_tags, num_tags),
                                    minval=-0.1, maxval=0.1, dtype=jnp.float32)
    transition = transition.at[:, sos_tag].set(-10000.0)
    transition = transition.at[eos_tag, :].set(-10000.0)

    emissions = jax.random.normal(k_em, (batch, seq_len, num_tags), dtype=jnp.float32)
    # tags drawn from the "real" tags (exclude sos/eos ids), typical tagging setup
    tags = jax.random.randint(k_tags, (batch, seq_len), 0, 4, dtype=jnp.int32)

    # valid-prefix mask (lengths 8, 5, 7, 3)
    lengths = jnp.array([8, 5, 7, 3], dtype=jnp.int32)
    mask = (jnp.arange(seq_len)[None, :] < lengths[:, None]).astype(jnp.float32)

    nll = linear_crf_nll(emissions, tags, mask, transition,
                         sos_tag=sos_tag, eos_tag=eos_tag)
    nll = jax.block_until_ready(nll)

    ref = _reference_nll(emissions, tags, mask, transition, sos_tag, eos_tag)
    ref = jax.block_until_ready(ref)

    assert np.allclose(np.asarray(nll), np.asarray(ref), rtol=1e-4, atol=1e-3), (nll, ref)
    print("KERNEL_OK")
</pallas_src>

<mosaic_0001>
module attributes {stable_mosaic.version = 11 : i64} {
  func.func @kernel(%arg0: i32, %arg1: memref<8x6x128xf32, #tpu.memory_space<vmem>>, %arg2: memref<8x128xi32, #tpu.memory_space<vmem>>, %arg3: memref<8x128xf32, #tpu.memory_space<vmem>>, %arg4: memref<6x6xf32, #tpu.memory_space<vmem>>, %arg5: memref<6x1xf32, #tpu.memory_space<vmem>>, %arg6: memref<6x1xf32, #tpu.memory_space<vmem>>, %arg7: memref<1x128xf32, #tpu.memory_space<vmem>>) attributes {dimension_semantics = [#tpu.dimension_semantics<parallel>], iteration_bounds = array<i64: 1>, scalar_prefetch = 0 : i64, scratch_operands = 0 : i64, tpu.core_type = #tpu.core_type<tc>, window_params = [{transform_indices = @transform_0, window_bounds = array<i64: 8, 6, 128>}, {transform_indices = @transform_1, window_bounds = array<i64: 8, 128>}, {transform_indices = @transform_2, window_bounds = array<i64: 8, 128>}, {pipeline_mode = #tpu.pipeline_mode<synchronous>, transform_indices = @transform_3, window_bounds = array<i64: 6, 6>}, {pipeline_mode = #tpu.pipeline_mode<synchronous>, transform_indices = @transform_4, window_bounds = array<i64: 6, 1>}, {pipeline_mode = #tpu.pipeline_mode<synchronous>, transform_indices = @transform_5, window_bounds = array<i64: 6, 1>}, {transform_indices = @transform_6, window_bounds = array<i64: 1, 128>}]} {
    %c0 = arith.constant 0 : index
    %c0_0 = arith.constant 0 : index
    %c0_1 = arith.constant 0 : index
    %0 = vector.load %arg1[%c0, %c0_0, %c0_1] : memref<8x6x128xf32, #tpu.memory_space<vmem>>, vector<8x6x128xf32>
    %c0_2 = arith.constant 0 : index
    %c0_3 = arith.constant 0 : index
    %1 = vector.load %arg2[%c0_2, %c0_3] : memref<8x128xi32, #tpu.memory_space<vmem>>, vector<8x128xi32>
    %c0_4 = arith.constant 0 : index
    %c0_5 = arith.constant 0 : index
    %2 = vector.load %arg3[%c0_4, %c0_5] : memref<8x128xf32, #tpu.memory_space<vmem>>, vector<8x128xf32>
    %c0_6 = arith.constant 0 : index
    %c0_7 = arith.constant 0 : index
    %3 = vector.load %arg4[%c0_6, %c0_7] : memref<6x6xf32, #tpu.memory_space<vmem>>, vector<6x6xf32>
    %c0_8 = arith.constant 0 : index
    %c0_9 = arith.constant 0 : index
    %4 = vector.load %arg5[%c0_8, %c0_9] : memref<6x1xf32, #tpu.memory_space<vmem>>, vector<6x1xf32>
    %c0_10 = arith.constant 0 : index
    %c0_11 = arith.constant 0 : index
    %5 = vector.load %arg6[%c0_10, %c0_11] : memref<6x1xf32, #tpu.memory_space<vmem>>, vector<6x1xf32>
    %6 = tpu.iota {dimensions = array<i32: 1>} : vector<8x6x128xi32>
    %7 = vector.shape_cast %1 : vector<8x128xi32> to vector<8x1x128xi32>
    %8 = vector.broadcast %7 : vector<8x1x128xi32> to vector<8x6x128xi32>
    %9 = arith.cmpi eq, %6, %8 : vector<8x6x128xi32>
    %10 = arith.extui %9 : vector<8x6x128xi1> to vector<8x6x128xi32>
    %11 = arith.sitofp %10 : vector<8x6x128xi32> to vector<8x6x128xf32>
    %12 = arith.mulf %0, %11 : vector<8x6x128xf32>
    %cst = arith.constant dense<0.000000e+00> : vector<8x128xf32>
    %13 = vector.multi_reduction <add>, %12, %cst [1] : vector<8x6x128xf32> to vector<8x128xf32>
    %14 = vector.extract_strided_slice %11 {offsets = [0, 0, 0], sizes = [1, 6, 128], strides = [1, 1, 1]} : vector<8x6x128xf32> to vector<1x6x128xf32>
    %15 = vector.shape_cast %14 : vector<1x6x128xf32> to vector<6x128xf32>
    %16 = vector.broadcast %4 : vector<6x1xf32> to vector<6x128xf32>
    %17 = arith.mulf %15, %16 : vector<6x128xf32>
    %cst_12 = arith.constant dense<0.000000e+00> : vector<128xf32>
    %18 = vector.multi_reduction <add>, %17, %cst_12 [0] : vector<6x128xf32> to vector<128xf32>
    %19 = vector.shape_cast %18 : vector<128xf32> to vector<1x128xf32>
    %20 = vector.extract_strided_slice %13 {offsets = [0, 0], sizes = [1, 128], strides = [1, 1]} : vector<8x128xf32> to vector<1x128xf32>
    %21 = arith.addf %20, %19 : vector<1x128xf32>
    %cst_13 = arith.constant dense<0.000000e+00> : vector<128xf32>
    %22 = vector.multi_reduction <add>, %2, %cst_13 [0] : vector<8x128xf32> to vector<128xf32>
    %23 = vector.shape_cast %22 : vector<128xf32> to vector<1x128xf32>
    %24 = arith.fptosi %23 : vector<1x128xf32> to vector<1x128xi32>
    %c1_i32 = arith.constant 1 : i32
    %25 = vector.broadcast %c1_i32 : i32 to vector<1x128xi32>
    %26 = arith.subi %24, %25 : vector<1x128xi32>
    %27 = tpu.iota {dimensions = array<i32: 0>} : vector<8x128xi32>
    %28 = vector.broadcast %26 : vector<1x128xi32> to vector<8x128xi32>
    %29 = arith.cmpi eq, %27, %28 : vector<8x128xi32>
    %30 = arith.extui %29 : vector<8x128xi1> to vector<8x128xi32>
    %31 = arith.sitofp %30 : vector<8x128xi32> to vector<8x128xf32>
    %32 = vector.shape_cast %31 : vector<8x128xf32> to vector<8x1x128xf32>
    %33 = vector.broadcast %32 : vector<8x1x128xf32> to vector<8x6x128xf32>
    %34 = arith.mulf %11, %33 : vector<8x6x128xf32>
    %cst_14 = arith.constant dense<0.000000e+00> : vector<6x128xf32>
    %35 = vector.multi_reduction <add>, %34, %cst_14 [0] : vector<8x6x128xf32> to vector<6x128xf32>
    %36 = vector.broadcast %5 : vector<6x1xf32> to vector<6x128xf32>
    %37 = arith.mulf %35, %36 : vector<6x128xf32>
    %cst_15 = arith.constant dense<0.000000e+00> : vector<128xf32>
    %38 = vector.multi_reduction <add>, %37, %cst_15 [0] : vector<6x128xf32> to vector<128xf32>
    %39 = vector.shape_cast %38 : vector<128xf32> to vector<1x128xf32>
    %40 = arith.addf %21, %39 : vector<1x128xf32>
    %41 = math.exp %3 : vector<6x6xf32>
    %42 = vector.extract_strided_slice %0 {offsets = [0, 0, 0], sizes = [1, 6, 128], strides = [1, 1, 1]} : vector<8x6x128xf32> to vector<1x6x128xf32>
    %43 = vector.shape_cast %42 : vector<1x6x128xf32> to vector<6x128xf32>
    %44 = vector.broadcast %4 : vector<6x1xf32> to vector<6x128xf32>
    %45 = arith.addf %44, %43 : vector<6x128xf32>
    %46 = vector.extract_strided_slice %2 {offsets = [1, 0], sizes = [1, 128], strides = [1, 1]} : vector<8x128xf32> to vector<1x128xf32>
    %47 = vector.extract_strided_slice %11 {offsets = [0, 0, 0], sizes = [1, 6, 128], strides = [1, 1, 1]} : vector<8x6x128xf32> to vector<1x6x128xf32>
    %48 = vector.shape_cast %47 : vector<1x6x128xf32> to vector<6x128xf32>
    %49 = vector.extract_strided_slice %11 {offsets = [1, 0, 0], sizes = [1, 6, 128], strides = [1, 1, 1]} : vector<8x6x128xf32> to vector<1x6x128xf32>
    %50 = vector.shape_cast %49 : vector<1x6x128xf32> to vector<6x128xf32>
    %cst_16 = arith.constant dense<0.000000e+00> : vector<6x128xf32>
    %51 = tpu.matmul %3, %48, %cst_16 {dimension_numbers = #tpu.dot_dimension_numbers<[1], [0], [0], [1], [0, 0, 1, 1], [], []>, precision = #tpu.contract_precision<fp32>} : vector<6x6xf32>, vector<6x128xf32>, vector<6x128xf32> -> vector<6x128xf32>
    %52 = arith.mulf %51, %50 : vector<6x128xf32>
    %cst_17 = arith.constant dense<0.000000e+00> : vector<128xf32>
    %53 = vector.multi_reduction <add>, %52, %cst_17 [0] : vector<6x128xf32> to vector<128xf32>
    %54 = vector.shape_cast %53 : vector<128xf32> to vector<1x128xf32>
    %55 = vector.extract_strided_slice %13 {offsets = [1, 0], sizes = [1, 128], strides = [1, 1]} : vector<8x128xf32> to vector<1x128xf32>
    %56 = arith.addf %55, %54 : vector<1x128xf32>
    %57 = arith.mulf %56, %46 : vector<1x128xf32>
    %58 = arith.addf %40, %57 : vector<1x128xf32>
    %cst_18 = arith.constant dense<0xFF800000> : vector<128xf32>
    %59 = vector.multi_reduction <maximumf>, %45, %cst_18 [0] : vector<6x128xf32> to vector<128xf32>
    %60 = vector.shape_cast %59 : vector<128xf32> to vector<1x128xf32>
    %61 = vector.broadcast %60 : vector<1x128xf32> to vector<6x128xf32>
    %62 = arith.subf %45, %61 : vector<6x128xf32>
    %63 = math.exp %62 : vector<6x128xf32>
    %cst_19 = arith.constant dense<0.000000e+00> : vector<6x128xf32>
    %64 = tpu.matmul %41, %63, %cst_19 {dimension_numbers = #tpu.dot_dimension_numbers<[1], [0], [0], [1], [0, 0, 1, 1], [], []>, precision = #tpu.contract_precision<fp32>} : vector<6x6xf32>, vector<6x128xf32>, vector<6x128xf32> -> vector<6x128xf32>
    %65 = vector.extract_strided_slice %0 {offsets = [1, 0, 0], sizes = [1, 6, 128], strides = [1, 1, 1]} : vector<8x6x128xf32> to vector<1x6x128xf32>
    %66 = vector.shape_cast %65 : vector<1x6x128xf32> to vector<6x128xf32>
    %67 = vector.broadcast %60 : vector<1x128xf32> to vector<6x128xf32>
    %68 = arith.addf %66, %67 : vector<6x128xf32>
    %69 = math.log %64 : vector<6x128xf32>
    %70 = arith.addf %68, %69 : vector<6x128xf32>
    %cst_20 = arith.constant 0.000000e+00 : f32
    %71 = vector.broadcast %cst_20 : f32 to vector<1x128xf32>
    %72 = arith.cmpf ogt, %46, %71 : vector<1x128xf32>
    %73 = vector.shape_cast %72 : vector<1x128xi1> to vector<1x128xi1>
    %74 = vector.broadcast %73 : vector<1x128xi1> to vector<6x128xi1>
    %75 = arith.select %74, %70, %45 : vector<6x128xi1>, vector<6x128xf32>
    %76 = vector.extract_strided_slice %2 {offsets = [2, 0], sizes = [1, 128], strides = [1, 1]} : vector<8x128xf32> to vector<1x128xf32>
    %77 = vector.extract_strided_slice %11 {offsets = [1, 0, 0], sizes = [1, 6, 128], strides = [1, 1, 1]} : vector<8x6x128xf32> to vector<1x6x128xf32>
    %78 = vector.shape_cast %77 : vector<1x6x128xf32> to vector<6x128xf32>
    %79 = vector.extract_strided_slice %11 {offsets = [2, 0, 0], sizes = [1, 6, 128], strides = [1, 1, 1]} : vector<8x6x128xf32> to vector<1x6x128xf32>
    %80 = vector.shape_cast %79 : vector<1x6x128xf32> to vector<6x128xf32>
    %cst_21 = arith.constant dense<0.000000e+00> : vector<6x128xf32>
    %81 = tpu.matmul %3, %78, %cst_21 {dimension_numbers = #tpu.dot_dimension_numbers<[1], [0], [0], [1], [0, 0, 1, 1], [], []>, precision = #tpu.contract_precision<fp32>} : vector<6x6xf32>, vector<6x128xf32>, vector<6x128xf32> -> vector<6x128xf32>
    %82 = arith.mulf %81, %80 : vector<6x128xf32>
    %cst_22 = arith.constant dense<0.000000e+00> : vector<128xf32>
    %83 = vector.multi_reduction <add>, %82, %cst_22 [0] : vector<6x128xf32> to vector<128xf32>
    %84 = vector.shape_cast %83 : vector<128xf32> to vector<1x128xf32>
    %85 = vector.extract_strided_slice %13 {offsets = [2, 0], sizes = [1, 128], strides = [1, 1]} : vector<8x128xf32> to vector<1x128xf32>
    %86 = arith.addf %85, %84 : vector<1x128xf32>
    %87 = arith.mulf %86, %76 : vector<1x128xf32>
    %88 = arith.addf %58, %87 : vector<1x128xf32>
    %cst_23 = arith.constant dense<0xFF800000> : vector<128xf32>
    %89 = vector.multi_reduction <maximumf>, %75, %cst_23 [0] : vector<6x128xf32> to vector<128xf32>
    %90 = vector.shape_cast %89 : vector<128xf32> to vector<1x128xf32>
    %91 = vector.broadcast %90 : vector<1x128xf32> to vector<6x128xf32>
    %92 = arith.subf %75, %91 : vector<6x128xf32>
    %93 = math.exp %92 : vector<6x128xf32>
    %cst_24 = arith.constant dense<0.000000e+00> : vector<6x128xf32>
    %94 = tpu.matmul %41, %93, %cst_24 {dimension_numbers = #tpu.dot_dimension_numbers<[1], [0], [0], [1], [0, 0, 1, 1], [], []>, precision = #tpu.contract_precision<fp32>} : vector<6x6xf32>, vector<6x128xf32>, vector<6x128xf32> -> vector<6x128xf32>
    %95 = vector.extract_strided_slice %0 {offsets = [2, 0, 0], sizes = [1, 6, 128], strides = [1, 1, 1]} : vector<8x6x128xf32> to vector<1x6x128xf32>
    %96 = vector.shape_cast %95 : vector<1x6x128xf32> to vector<6x128xf32>
    %97 = vector.broadcast %90 : vector<1x128xf32> to vector<6x128xf32>
    %98 = arith.addf %96, %97 : vector<6x128xf32>
    %99 = math.log %94 : vector<6x128xf32>
    %100 = arith.addf %98, %99 : vector<6x128xf32>
    %cst_25 = arith.constant 0.000000e+00 : f32
    %101 = vector.broadcast %cst_25 : f32 to vector<1x128xf32>
    %102 = arith.cmpf ogt, %76, %101 : vector<1x128xf32>
    %103 = vector.shape_cast %102 : vector<1x128xi1> to vector<1x128xi1>
    %104 = vector.broadcast %103 : vector<1x128xi1> to vector<6x128xi1>
    %105 = arith.select %104, %100, %75 : vector<6x128xi1>, vector<6x128xf32>
    %106 = vector.extract_strided_slice %2 {offsets = [3, 0], sizes = [1, 128], strides = [1, 1]} : vector<8x128xf32> to vector<1x128xf32>
    %107 = vector.extract_strided_slice %11 {offsets = [2, 0, 0], sizes = [1, 6, 128], strides = [1, 1, 1]} : vector<8x6x128xf32> to vector<1x6x128xf32>
    %108 = vector.shape_cast %107 : vector<1x6x128xf32> to vector<6x128xf32>
    %109 = vector.extract_strided_slice %11 {offsets = [3, 0, 0], sizes = [1, 6, 128], strides = [1, 1, 1]} : vector<8x6x128xf32> to vector<1x6x128xf32>
    %110 = vector.shape_cast %109 : vector<1x6x128xf32> to vector<6x128xf32>
    %cst_26 = arith.constant dense<0.000000e+00> : vector<6x128xf32>
    %111 = tpu.matmul %3, %108, %cst_26 {dimension_numbers = #tpu.dot_dimension_numbers<[1], [0], [0], [1], [0, 0, 1, 1], [], []>, precision = #tpu.contract_precision<fp32>} : vector<6x6xf32>, vector<6x128xf32>, vector<6x128xf32> -> vector<6x128xf32>
    %112 = arith.mulf %111, %110 : vector<6x128xf32>
    %cst_27 = arith.constant dense<0.000000e+00> : vector<128xf32>
    %113 = vector.multi_reduction <add>, %112, %cst_27 [0] : vector<6x128xf32> to vector<128xf32>
    %114 = vector.shape_cast %113 : vector<128xf32> to vector<1x128xf32>
    %115 = vector.extract_strided_slice %13 {offsets = [3, 0], sizes = [1, 128], strides = [1, 1]} : vector<8x128xf32> to vector<1x128xf32>
    %116 = arith.addf %115, %114 : vector<1x128xf32>
    %117 = arith.mulf %116, %106 : vector<1x128xf32>
    %118 = arith.addf %88, %117 : vector<1x128xf32>
    %cst_28 = arith.constant dense<0xFF800000> : vector<128xf32>
    %119 = vector.multi_reduction <maximumf>, %105, %cst_28 [0] : vector<6x128xf32> to vector<128xf32>
    %120 = vector.shape_cast %119 : vector<128xf32> to vector<1x128xf32>
    %121 = vector.broadcast %120 : vector<1x128xf32> to vector<6x128xf32>
    %122 = arith.subf %105, %121 : vector<6x128xf32>
    %123 = math.exp %122 : vector<6x128xf32>
    %cst_29 = arith.constant dense<0.000000e+00> : vector<6x128xf32>
    %124 = tpu.matmul %41, %123, %cst_29 {dimension_numbers = #tpu.dot_dimension_numbers<[1], [0], [0], [1], [0, 0, 1, 1], [], []>, precision = #tpu.contract_precision<fp32>} : vector<6x6xf32>, vector<6x128xf32>, vector<6x128xf32> -> vector<6x128xf32>
    %125 = vector.extract_strided_slice %0 {offsets = [3, 0, 0], sizes = [1, 6, 128], strides = [1, 1, 1]} : vector<8x6x128xf32> to vector<1x6x128xf32>
    %126 = vector.shape_cast %125 : vector<1x6x128xf32> to vector<6x128xf32>
    %127 = vector.broadcast %120 : vector<1x128xf32> to vector<6x128xf32>
    %128 = arith.addf %126, %127 : vector<6x128xf32>
    %129 = math.log %124 : vector<6x128xf32>
    %130 = arith.addf %128, %129 : vector<6x128xf32>
    %cst_30 = arith.constant 0.000000e+00 : f32
    %131 = vector.broadcast %cst_30 : f32 to vector<1x128xf32>
    %132 = arith.cmpf ogt, %106, %131 : vector<1x128xf32>
    %133 = vector.shape_cast %132 : vector<1x128xi1> to vector<1x128xi1>
    %134 = vector.broadcast %133 : vector<1x128xi1> to vector<6x128xi1>
    %135 = arith.select %134, %130, %105 : vector<6x128xi1>, vector<6x128xf32>
    %136 = vector.extract_strided_slice %2 {offsets = [4, 0], sizes = [1, 128], strides = [1, 1]} : vector<8x128xf32> to vector<1x128xf32>
    %137 = vector.extract_strided_slice %11 {offsets = [3, 0, 0], sizes = [1, 6, 128], strides = [1, 1, 1]} : vector<8x6x128xf32> to vector<1x6x128xf32>
    %138 = vector.shape_cast %137 : vector<1x6x128xf32> to vector<6x128xf32>
    %139 = vector.extract_strided_slice %11 {offsets = [4, 0, 0], sizes = [1, 6, 128], strides = [1, 1, 1]} : vector<8x6x128xf32> to vector<1x6x128xf32>
    %140 = vector.shape_cast %139 : vector<1x6x128xf32> to vector<6x128xf32>
    %cst_31 = arith.constant dense<0.000000e+00> : vector<6x128xf32>
    %141 = tpu.matmul %3, %138, %cst_31 {dimension_numbers = #tpu.dot_dimension_numbers<[1], [0], [0], [1], [0, 0, 1, 1], [], []>, precision = #tpu.contract_precision<fp32>} : vector<6x6xf32>, vector<6x128xf32>, vector<6x128xf32> -> vector<6x128xf32>
    %142 = arith.mulf %141, %140 : vector<6x128xf32>
    %cst_32 = arith.constant dense<0.000000e+00> : vector<128xf32>
    %143 = vector.multi_reduction <add>, %142, %cst_32 [0] : vector<6x128xf32> to vector<128xf32>
    %144 = vector.shape_cast %143 : vector<128xf32> to vector<1x128xf32>
    %145 = vector.extract_strided_slice %13 {offsets = [4, 0], sizes = [1, 128], strides = [1, 1]} : vector<8x128xf32> to vector<1x128xf32>
    %146 = arith.addf %145, %144 : vector<1x128xf32>
    %147 = arith.mulf %146, %136 : vector<1x128xf32>
    %148 = arith.addf %118, %147 : vector<1x128xf32>
    %cst_33 = arith.constant dense<0xFF800000> : vector<128xf32>
    %149 = vector.multi_reduction <maximumf>, %135, %cst_33 [0] : vector<6x128xf32> to vector<128xf32>
    %150 = vector.shape_cast %149 : vector<128xf32> to vector<1x128xf32>
    %151 = vector.broadcast %150 : vector<1x128xf32> to vector<6x128xf32>
    %152 = arith.subf %135, %151 : vector<6x128xf32>
    %153 = math.exp %152 : vector<6x128xf32>
    %cst_34 = arith.constant dense<0.000000e+00> : vector<6x128xf32>
    %154 = tpu.matmul %41, %153, %cst_34 {dimension_numbers = #tpu.dot_dimension_numbers<[1], [0], [0], [1], [0, 0, 1, 1], [], []>, precision = #tpu.contract_precision<fp32>} : vector<6x6xf32>, vector<6x128xf32>, vector<6x128xf32> -> vector<6x128xf32>
    %155 = vector.extract_strided_slice %0 {offsets = [4, 0, 0], sizes = [1, 6, 128], strides = [1, 1, 1]} : vector<8x6x128xf32> to vector<1x6x128xf32>
    %156 = vector.shape_cast %155 : vector<1x6x128xf32> to vector<6x128xf32>
    %157 = vector.broadcast %150 : vector<1x128xf32> to vector<6x128xf32>
    %158 = arith.addf %156, %157 : vector<6x128xf32>
    %159 = math.log %154 : vector<6x128xf32>
    %160 = arith.addf %158, %159 : vector<6x128xf32>
    %cst_35 = arith.constant 0.000000e+00 : f32
    %161 = vector.broadcast %cst_35 : f32 to vector<1x128xf32>
    %162 = arith.cmpf ogt, %136, %161 : vector<1x128xf32>
    %163 = vector.shape_cast %162 : vector<1x128xi1> to vector<1x128xi1>
    %164 = vector.broadcast %163 : vector<1x128xi1> to vector<6x128xi1>
    %165 = arith.select %164, %160, %135 : vector<6x128xi1>, vector<6x128xf32>
    %166 = vector.extract_strided_slice %2 {offsets = [5, 0], sizes = [1, 128], strides = [1, 1]} : vector<8x128xf32> to vector<1x128xf32>
    %167 = vector.extract_strided_slice %11 {offsets = [4, 0, 0], sizes = [1, 6, 128], strides = [1, 1, 1]} : vector<8x6x128xf32> to vector<1x6x128xf32>
    %168 = vector.shape_cast %167 : vector<1x6x128xf32> to vector<6x128xf32>
    %169 = vector.extract_strided_slice %11 {offsets = [5, 0, 0], sizes = [1, 6, 128], strides = [1, 1, 1]} : vector<8x6x128xf32> to vector<1x6x128xf32>
    %170 = vector.shape_cast %169 : vector<1x6x128xf32> to vector<6x128xf32>
    %cst_36 = arith.constant dense<0.000000e+00> : vector<6x128xf32>
    %171 = tpu.matmul %3, %168, %cst_36 {dimension_numbers = #tpu.dot_dimension_numbers<[1], [0], [0], [1], [0, 0, 1, 1], [], []>, precision = #tpu.contract_precision<fp32>} : vector<6x6xf32>, vector<6x128xf32>, vector<6x128xf32> -> vector<6x128xf32>
    %172 = arith.mulf %171, %170 : vector<6x128xf32>
    %cst_37 = arith.constant dense<0.000000e+00> : vector<128xf32>
    %173 = vector.multi_reduction <add>, %172, %cst_37 [0] : vector<6x128xf32> to vector<128xf32>
    %174 = vector.shape_cast %173 : vector<128xf32> to vector<1x128xf32>
    %175 = vector.extract_strided_slice %13 {offsets = [5, 0], sizes = [1, 128], strides = [1, 1]} : vector<8x128xf32> to vector<1x128xf32>
    %176 = arith.addf %175, %174 : vector<1x128xf32>
    %177 = arith.mulf %176, %166 : vector<1x128xf32>
    %178 = arith.addf %148, %177 : vector<1x128xf32>
    %cst_38 = arith.constant dense<0xFF800000> : vector<128xf32>
    %179 = vector.multi_reduction <maximumf>, %165, %cst_38 [0] : vector<6x128xf32> to vector<128xf32>
    %180 = vector.shape_cast %179 : vector<128xf32> to vector<1x128xf32>
    %181 = vector.broadcast %180 : vector<1x128xf32> to vector<6x128xf32>
    %182 = arith.subf %165, %181 : vector<6x128xf32>
    %183 = math.exp %182 : vector<6x128xf32>
    %cst_39 = arith.constant dense<0.000000e+00> : vector<6x128xf32>
    %184 = tpu.matmul %41, %183, %cst_39 {dimension_numbers = #tpu.dot_dimension_numbers<[1], [0], [0], [1], [0, 0, 1, 1], [], []>, precision = #tpu.contract_precision<fp32>} : vector<6x6xf32>, vector<6x128xf32>, vector<6x128xf32> -> vector<6x128xf32>
    %185 = vector.extract_strided_slice %0 {offsets = [5, 0, 0], sizes = [1, 6, 128], strides = [1, 1, 1]} : vector<8x6x128xf32> to vector<1x6x128xf32>
    %186 = vector.shape_cast %185 : vector<1x6x128xf32> to vector<6x128xf32>
    %187 = vector.broadcast %180 : vector<1x128xf32> to vector<6x128xf32>
    %188 = arith.addf %186, %187 : vector<6x128xf32>
    %189 = math.log %184 : vector<6x128xf32>
    %190 = arith.addf %188, %189 : vector<6x128xf32>
    %cst_40 = arith.constant 0.000000e+00 : f32
    %191 = vector.broadcast %cst_40 : f32 to vector<1x128xf32>
    %192 = arith.cmpf ogt, %166, %191 : vector<1x128xf32>
    %193 = vector.shape_cast %192 : vector<1x128xi1> to vector<1x128xi1>
    %194 = vector.broadcast %193 : vector<1x128xi1> to vector<6x128xi1>
    %195 = arith.select %194, %190, %165 : vector<6x128xi1>, vector<6x128xf32>
    %196 = vector.extract_strided_slice %2 {offsets = [6, 0], sizes = [1, 128], strides = [1, 1]} : vector<8x128xf32> to vector<1x128xf32>
    %197 = vector.extract_strided_slice %11 {offsets = [5, 0, 0], sizes = [1, 6, 128], strides = [1, 1, 1]} : vector<8x6x128xf32> to vector<1x6x128xf32>
    %198 = vector.shape_cast %197 : vector<1x6x128xf32> to vector<6x128xf32>
    %199 = vector.extract_strided_slice %11 {offsets = [6, 0, 0], sizes = [1, 6, 128], strides = [1, 1, 1]} : vector<8x6x128xf32> to vector<1x6x128xf32>
    %200 = vector.shape_cast %199 : vector<1x6x128xf32> to vector<6x128xf32>
    %cst_41 = arith.constant dense<0.000000e+00> : vector<6x128xf32>
    %201 = tpu.matmul %3, %198, %cst_41 {dimension_numbers = #tpu.dot_dimension_numbers<[1], [0], [0], [1], [0, 0, 1, 1], [], []>, precision = #tpu.contract_precision<fp32>} : vector<6x6xf32>, vector<6x128xf32>, vector<6x128xf32> -> vector<6x128xf32>
    %202 = arith.mulf %201, %200 : vector<6x128xf32>
    %cst_42 = arith.constant dense<0.000000e+00> : vector<128xf32>
    %203 = vector.multi_reduction <add>, %202, %cst_42 [0] : vector<6x128xf32> to vector<128xf32>
    %204 = vector.shape_cast %203 : vector<128xf32> to vector<1x128xf32>
    %205 = vector.extract_strided_slice %13 {offsets = [6, 0], sizes = [1, 128], strides = [1, 1]} : vector<8x128xf32> to vector<1x128xf32>
    %206 = arith.addf %205, %204 : vector<1x128xf32>
    %207 = arith.mulf %206, %196 : vector<1x128xf32>
    %208 = arith.addf %178, %207 : vector<1x128xf32>
    %cst_43 = arith.constant dense<0xFF800000> : vector<128xf32>
    %209 = vector.multi_reduction <maximumf>, %195, %cst_43 [0] : vector<6x128xf32> to vector<128xf32>
    %210 = vector.shape_cast %209 : vector<128xf32> to vector<1x128xf32>
    %211 = vector.broadcast %210 : vector<1x128xf32> to vector<6x128xf32>
    %212 = arith.subf %195, %211 : vector<6x128xf32>
    %213 = math.exp %212 : vector<6x128xf32>
    %cst_44 = arith.constant dense<0.000000e+00> : vector<6x128xf32>
    %214 = tpu.matmul %41, %213, %cst_44 {dimension_numbers = #tpu.dot_dimension_numbers<[1], [0], [0], [1], [0, 0, 1, 1], [], []>, precision = #tpu.contract_precision<fp32>} : vector<6x6xf32>, vector<6x128xf32>, vector<6x128xf32> -> vector<6x128xf32>
    %215 = vector.extract_strided_slice %0 {offsets = [6, 0, 0], sizes = [1, 6, 128], strides = [1, 1, 1]} : vector<8x6x128xf32> to vector<1x6x128xf32>
    %216 = vector.shape_cast %215 : vector<1x6x128xf32> to vector<6x128xf32>
    %217 = vector.broadcast %210 : vector<1x128xf32> to vector<6x128xf32>
    %218 = arith.addf %216, %217 : vector<6x128xf32>
    %219 = math.log %214 : vector<6x128xf32>
    %220 = arith.addf %218, %219 : vector<6x128xf32>
    %cst_45 = arith.constant 0.000000e+00 : f32
    %221 = vector.broadcast %cst_45 : f32 to vector<1x128xf32>
    %222 = arith.cmpf ogt, %196, %221 : vector<1x128xf32>
    %223 = vector.shape_cast %222 : vector<1x128xi1> to vector<1x128xi1>
    %224 = vector.broadcast %223 : vector<1x128xi1> to vector<6x128xi1>
    %225 = arith.select %224, %220, %195 : vector<6x128xi1>, vector<6x128xf32>
    %226 = vector.extract_strided_slice %2 {offsets = [7, 0], sizes = [1, 128], strides = [1, 1]} : vector<8x128xf32> to vector<1x128xf32>
    %227 = vector.extract_strided_slice %11 {offsets = [6, 0, 0], sizes = [1, 6, 128], strides = [1, 1, 1]} : vector<8x6x128xf32> to vector<1x6x128xf32>
    %228 = vector.shape_cast %227 : vector<1x6x128xf32> to vector<6x128xf32>
    %229 = vector.extract_strided_slice %11 {offsets = [7, 0, 0], sizes = [1, 6, 128], strides = [1, 1, 1]} : vector<8x6x128xf32> to vector<1x6x128xf32>
    %230 = vector.shape_cast %229 : vector<1x6x128xf32> to vector<6x128xf32>
    %cst_46 = arith.constant dense<0.000000e+00> : vector<6x128xf32>
    %231 = tpu.matmul %3, %228, %cst_46 {dimension_numbers = #tpu.dot_dimension_numbers<[1], [0], [0], [1], [0, 0, 1, 1], [], []>, precision = #tpu.contract_precision<fp32>} : vector<6x6xf32>, vector<6x128xf32>, vector<6x128xf32> -> vector<6x128xf32>
    %232 = arith.mulf %231, %230 : vector<6x128xf32>
    %cst_47 = arith.constant dense<0.000000e+00> : vector<128xf32>
    %233 = vector.multi_reduction <add>, %232, %cst_47 [0] : vector<6x128xf32> to vector<128xf32>
    %234 = vector.shape_cast %233 : vector<128xf32> to vector<1x128xf32>
    %235 = vector.extract_strided_slice %13 {offsets = [7, 0], sizes = [1, 128], strides = [1, 1]} : vector<8x128xf32> to vector<1x128xf32>
    %236 = arith.addf %235, %234 : vector<1x128xf32>
    %237 = arith.mulf %236, %226 : vector<1x128xf32>
    %238 = arith.addf %208, %237 : vector<1x128xf32>
    %cst_48 = arith.constant dense<0xFF800000> : vector<128xf32>
    %239 = vector.multi_reduction <maximumf>, %225, %cst_48 [0] : vector<6x128xf32> to vector<128xf32>
    %240 = vector.shape_cast %239 : vector<128xf32> to vector<1x128xf32>
    %241 = vector.broadcast %240 : vector<1x128xf32> to vector<6x128xf32>
    %242 = arith.subf %225, %241 : vector<6x128xf32>
    %243 = math.exp %242 : vector<6x128xf32>
    %cst_49 = arith.constant dense<0.000000e+00> : vector<6x128xf32>
    %244 = tpu.matmul %41, %243, %cst_49 {dimension_numbers = #tpu.dot_dimension_numbers<[1], [0], [0], [1], [0, 0, 1, 1], [], []>, precision = #tpu.contract_precision<fp32>} : vector<6x6xf32>, vector<6x128xf32>, vector<6x128xf32> -> vector<6x128xf32>
    %245 = vector.extract_strided_slice %0 {offsets = [7, 0, 0], sizes = [1, 6, 128], strides = [1, 1, 1]} : vector<8x6x128xf32> to vector<1x6x128xf32>
    %246 = vector.shape_cast %245 : vector<1x6x128xf32> to vector<6x128xf32>
    %247 = vector.broadcast %240 : vector<1x128xf32> to vector<6x128xf32>
    %248 = arith.addf %246, %247 : vector<6x128xf32>
    %249 = math.log %244 : vector<6x128xf32>
    %250 = arith.addf %248, %249 : vector<6x128xf32>
    %cst_50 = arith.constant 0.000000e+00 : f32
    %251 = vector.broadcast %cst_50 : f32 to vector<1x128xf32>
    %252 = arith.cmpf ogt, %226, %251 : vector<1x128xf32>
    %253 = vector.shape_cast %252 : vector<1x128xi1> to vector<1x128xi1>
    %254 = vector.broadcast %253 : vector<1x128xi1> to vector<6x128xi1>
    %255 = arith.select %254, %250, %225 : vector<6x128xi1>, vector<6x128xf32>
    %256 = vector.broadcast %5 : vector<6x1xf32> to vector<6x128xf32>
    %257 = arith.addf %255, %256 : vector<6x128xf32>
    %cst_51 = arith.constant dense<0xFF800000> : vector<128xf32>
    %258 = vector.multi_reduction <maximumf>, %257, %cst_51 [0] : vector<6x128xf32> to vector<128xf32>
    %259 = vector.shape_cast %258 : vector<128xf32> to vector<1x128xf32>
    %260 = vector.broadcast %259 : vector<1x128xf32> to vector<6x128xf32>
    %261 = arith.subf %257, %260 : vector<6x128xf32>
    %262 = math.exp %261 : vector<6x128xf32>
    %cst_52 = arith.constant dense<0.000000e+00> : vector<128xf32>
    %263 = vector.multi_reduction <add>, %262, %cst_52 [0] : vector<6x128xf32> to vector<128xf32>
    %264 = vector.shape_cast %263 : vector<128xf32> to vector<1x128xf32>
    %265 = math.log %264 : vector<1x128xf32>
    %266 = arith.addf %259, %265 : vector<1x128xf32>
    %267 = arith.subf %266, %238 : vector<1x128xf32>
    %c0_53 = arith.constant 0 : index
    %c0_54 = arith.constant 0 : index
    %268 = vector.load %arg7[%c0_53, %c0_54] : memref<1x128xf32, #tpu.memory_space<vmem>>, vector<1x128xf32>
    tpu.vector_store %arg7[%c0_53, %c0_54], %267 {strides = array<i32>} : memref<1x128xf32, #tpu.memory_space<vmem>>, vector<1x128xf32>,
    return
  }
  func.func @transform_0(%arg0: i32) -> (i32, i32, i32) {
    %c0_i32 = arith.constant 0 : i32
    %c0_i32_0 = arith.constant 0 : i32
    %c0_i32_1 = arith.constant 0 : i32
    return %c0_i32, %c0_i32_0, %arg0 : i32, i32, i32
  }
  func.func @transform_1(%arg0: i32) -> (i32, i32) {
    %c0_i32 = arith.constant 0 : i32
    %c0_i32_0 = arith.constant 0 : i32
    return %c0_i32, %arg0 : i32, i32
  }
  func.func @transform_2(%arg0: i32) -> (i32, i32) {
    %c0_i32 = arith.constant 0 : i32
    %c0_i32_0 = arith.constant 0 : i32
    return %c0_i32, %arg0 : i32, i32
  }
  func.func @transform_3(%arg0: i32) -> (i32, i32) {
    %c0_i32 = arith.constant 0 : i32
    %c0_i32_0 = arith.constant 0 : i32
    %c0_i32_1 = arith.constant 0 : i32
    return %c0_i32, %c0_i32_0 : i32, i32
  }
  func.func @transform_4(%arg0: i32) -> (i32, i32) {
    %c0_i32 = arith.constant 0 : i32
    %c0_i32_0 = arith.constant 0 : i32
    %c0_i32_1 = arith.constant 0 : i32
    return %c0_i32, %c0_i32_0 : i32, i32
  }
  func.func @transform_5(%arg0: i32) -> (i32, i32) {
    %c0_i32 = arith.constant 0 : i32
    %c0_i32_0 = arith.constant 0 : i32
    %c0_i32_1 = arith.constant 0 : i32
    return %c0_i32, %c0_i32_0 : i32, i32
  }
  func.func @transform_6(%arg0: i32) -> (i32, i32) {
    %c0_i32 = arith.constant 0 : i32
    %c0_i32_0 = arith.constant 0 : i32
    return %arg0, %c0_i32 : i32, i32
  }
}

</mosaic_0001>

<bundles_post_ra>
// kernel: linear_crf_nll.1
= control target key start
LH: loop header
LB: loop body
LE: loop exit
PB: predicated region body
PF: predicated region fallthrough
CT: control target
= control target key end

     0   :  { %v36_v0 = vlaneseq  ;;  %v7582_v1 = vmov 0   ;;  %v7583_v4 = vmov 0.0   ;;  %v7584_v5 = vmov 1966171168   ;;  %s8412_s2 = inlined_call_operand.vmem [shape: f32[8,128], index: 2, kind: input, shape index: {}]   ;;  %s8413_s4 = inlined_call_operand.vmem [shape: f32[6,1], index: 4, kind: input, shape index: {}]   ;;  %s8414_s5 = inlined_call_operand.vmem [shape: f32[6,1], index: 5, kind: input, shape index: {}]   ;;  %s8415_s1 = inlined_call_operand.vmem [shape: s32[8,128], index: 1, kind: input, shape index: {}]   ;;  %s8416_s3 = inlined_call_operand.vmem [shape: f32[6,6], index: 3, kind: input, shape index: {}]   ;;  %s8417_s0 = inlined_call_operand.vmem [shape: f32[8,6,128], index: 0, kind: input, shape index: {}]   ;;  %s8418_s6 = inlined_call_operand.vmem [shape: f32[1,128], index: 6, kind: output, shape index: {}]  }
   0x1   :  { %7545 = vset.pattern.permute.xlu0 %v7582_v1  ;;  %v7625_v2 = vld [vmem:[%s8412_s2] sm:$0xff]  ;;  %7119 = vmatprep.subr.mxu0 %v7583_v4  ;;  %v40_v6 = vunpack.c.l.s4 %v7584_v5  ;;  %vm7585_vm0 = vmmov 0   ;;  %vm363_vm1 = vcmask 48128   ;;  %vm151_vm2 = vcmask 1045504  }
   0x2   :  { %v34_v3 = vld [vmem:[%s8413_s4] sm:$0x3f]  ;;  %v7631_v7 = vshrl.u32 %v36_v0, 7  ;;  %7124 = vmatprep.subr.mxu1 %v7583_v4  ;;  %7121 = vmatprep.mubr.msk.f32.mxu0 %vm7585_vm0, %v7583_v4  ;;  %v222_v15 = vrot.slane %v7625_v2, 4  ;;  %vm1293_vm12 = vcmp.gt.f32.partialorder %v7625_v2, 0.0 }
   0x3   :  { %210 = vperm.xlu0 %7545, %v34_v3   ;;  %v33_v8 = vld [vmem:[%s8416_s3] sm:$0x3f]  ;;  %v41_v11 = vunpack.c.0.s8 %v40_v6  ;;  %7126 = vmatprep.mubr.msk.f32.mxu1 %vm7585_vm0, %v7583_v4 }
   0x4   :  { %v35_v9 = vld [vmem:[%s8414_s5] sm:$0x3f]  ;;  %v360_v12 = vmul.f32 1.442695, %v33_v8  ;;  %v365_v13 = vsel %vm363_vm1, %v33_v8, 0  ;;  %v223_v18 = vadd.f32 %v222_v15, %v7625_v2  ;;  %v7657_v20 = vsub.s32 0, %v7631_v7 }
   0x5   :  { %v31_v10 = vld [vmem:[%s8415_s1] sm:$0xff]  ;;  %v7650_v16 = vsub.s32 %v41_v11, %v7631_v7  ;;  %v7652_v17 = vand.u32 4294901760, %v365_v13 }
   0x6   :  { %v38_v14 = vcombine.high %v31_v10, %v31_v10  ;;  %7547 = vpow2.f32 %v360_v12  ;;  %v224_v23 = vrot.slane %v223_v18, 2 }
   0x7   :  { %348 = vperm.xlu0 %7545, %v35_v9   ;;  %v45_v19 = vrot.slane %v31_v10, %v7650_v16  ;;  %v7660_v21 = vsub.f32 %v365_v13, %v7652_v17 }
   0x8   :  { %v52_v22 = vrot.slane %v38_v14, %v7650_v16  ;;  %v225_v36 = vadd.f32 %v224_v23, %v223_v18 }
   0x9   :  { %v61_v24 = vrot.slane %v45_v19, %v7650_v16  ;;  %v7665_v25 = vand.u32 4294901760, %v7660_v21  ;;  %v53_v26 = vcombine.high %v45_v19, %v45_v19 }
   0xa   :  { %v54_v27 = vcombine.high %v52_v22, %v52_v22  ;;  %v7668_v28 = vrot.slane %v52_v22, %v7650_v16  ;;  %v226_v49 = vrot.slane %v225_v36, 1 }
   0xb   :  { %v90_v29 = vrot.slane %v61_v24, %v7657_v20  ;;  %v439_v30 = vsub.f32 %v7660_v21, %v7665_v25  ;;  %v75_v31 = vrot.slane %v53_v26, %v7650_v16  ;;  %v83_v33 = vcombine.high %v61_v24, %v61_v24 }
   0xc   :  { %v7675_v32 = vrot.slane %v54_v27, %v7650_v16  ;;  %v84_v34 = vcombine.high %v7668_v28, %v7668_v28  ;;  %v106_v35 = vrot.slane %v7668_v28, %v7657_v20  ;;  %v227_v53 = vadd.f32 %v226_v49, %v225_v36 }
   0xd   :  { %vm119_vm3 = vcmp.eq.s32.totalorder %v7631_v7, %v90_v29  ;;  %v7682_v37 = vand.u32 4294901760, %v439_v30  ;;  %v85_v38 = vcombine.high %v75_v31, %v75_v31  ;;  %v94_v41 = vrot.slane %v75_v31, %v7657_v20 }
   0xe   :  { %v86_v39 = vcombine.high %v7675_v32, %v7675_v32  ;;  %v7687_v40 = vsel %vm119_vm3, 1.0, %v7583_v4  ;;  %v98_v42 = vrot.slane %v83_v33, %v7657_v20  ;;  %v110_v43 = vrot.slane %v7675_v32, %v7657_v20 }
   0xf   :  { %7120 = vmatpush3.msk.msra.mxu0 %vm151_vm2, %v7687_v40  ;;  %v368_v44 = vsel %vm151_vm2, %v7687_v40, 0  ;;  %v102_v45 = vrot.slane %v85_v38, %v7657_v20  ;;  %v7699_v46 = vrot.slane %v84_v34, %v7657_v20  ;;  %v7539_v55 = vtrunc.f32 %v227_v53 }
  0x10   :  { %7122 = vmatmul.mubr.f32.vlgmr.msra.gmra.mxu0 %v7682_v37  ;;  %v478_v47 = vsub.f32 %v368_v44, %v368_v44  ;;  %7129 = vmatprep.subr.mxu0 %v7583_v4  ;;  %v7704_v48 = vrot.slane %v86_v39, %v7657_v20  ;;  %vm7736_vm5 = vcmp.eq.s32.totalorder %v7631_v7, %v94_v41 }
  0x11   :  { %7131 = vmatprep.mubr.msk.f32.mxu0 %vm7585_vm0, %v7583_v4  ;;  %v7540_v57 = vcvt.f32.s32 %v7539_v55  ;;  %vm121_vm6 = vcmp.eq.s32.totalorder %v7631_v7, %v98_v42  ;;  %vm122_vm7 = vcmp.eq.s32.totalorder %v7631_v7, %v102_v45  ;;  %vm7746_vm8 = vcmp.eq.s32.totalorder %v7631_v7, %v106_v35 }
  0x12   :  { %v479_v50 = vand.u32 4294901760, %v478_v47  ;;  %7130 = vmatpush3.msra.mxu0 %v478_v47  ;;  %vm7751_vm9 = vcmp.eq.s32.totalorder %v7631_v7, %v110_v43  ;;  %vm125_vm10 = vcmp.eq.s32.totalorder %v7631_v7, %v7699_v46  ;;  %vm126_vm11 = vcmp.eq.s32.totalorder %v7631_v7, %v7704_v48 }
  0x13   :  { %7139 = vmatprep.subr.mxu0 %v7583_v4  ;;  %v7548_v52 = vpop.eup %7547  ;;  %v6928_v58 = vadd.s32 4294967295, %v7540_v57  ;;  %v7766_v12 = vsel %vm7736_vm5, 1.0, %v7583_v4  ;;  %v7771_v13 = vsel %vm121_vm6, 1.0, %v7583_v4  ;;  %v7774_v14 = vsel %vm122_vm7, 1.0, %v7583_v4 }
  0x14   :  { %v480_v51 = vsub.f32 %v478_v47, %v479_v50  ;;  %7132 = vmatmul.mubr.f32.vlgmr.msra.gmra.mxu0 %v7660_v21  ;;  %v7715_v56 = vsel %vm363_vm1, %v7548_v52, 0  ;;  %v7782_v24 = vsel %vm7746_vm8, 1.0, %v7583_v4  ;;  %v7794_v32 = vsel %vm126_vm11, 1.0, %v7583_v4 }
  0x15   :  { %7140 = vmatpush3.msra.mxu0 %v479_v50  ;;  %7141 = vmatprep.mubr.msk.f32.mxu0 %vm7585_vm0, %v7583_v4  ;;  %vm230_vm4 = vcmp.eq.s32.totalorder %v7631_v7, %v6928_v58  ;;  %v7802_v36 = vsel %vm7751_vm9, 1.0, %v7583_v4  ;;  %v7813_v44 = vsel %vm125_vm10, 1.0, %v7583_v4 }
  0x16   :  { %v481_v54 = vand.u32 4294901760, %v480_v51  ;;  %7149 = vmatprep.subr.mxu0 %v7583_v4  ;;  %v6929_v59 = vsel %vm230_vm4, 1.0, %v7583_v4 }
  0x17   :  { %v234_v60 = vcombine.high %v6929_v59, %v6929_v59  ;;  %v241_v61 = vrot.slane %v6929_v59, %v7650_v16 }
  0x18   :  { %7125 = vmatpush3.msra.mxu1 %v481_v54  ;;  %7142 = vmatmul.mubr.f32.vlgmr.msra.gmra.mxu0 %v7652_v17 }
  0x19   :  { %7127 = vmatmul.mubr.f32.vlgmr.msra.gmra.mxu1 %v7652_v17  ;;  %7134 = vmatprep.subr.mxu1 %v7583_v4  ;;  %v248_v63 = vrot.slane %v234_v60, %v7650_v16  ;;  %v249_v0 = vcombine.high %v241_v61, %v241_v61  ;;  %v257_v3 = vrot.slane %v241_v61, %v7650_v16  ;;  %v23_v60 = vld [vmem:[%s8417_s0] sm:$0x3f] }
  0x1a   :  { %7135 = vmatpush3.msk.msra.mxu1 %vm151_vm2, %v7687_v40  ;;  %7136 = vmatprep.mubr.msk.f32.mxu1 %vm7585_vm0, %v7583_v4  ;;  %v143_v61 = vmul.f32 %v7687_v40, %v23_v60 }
  0x1b   :  { %7144 = vmatprep.subr.mxu1 %v7583_v4  ;;  %7151 = vmatprep.mubr.msk.f32.mxu0 %vm7585_vm0, %v7583_v4  ;;  %v250_v8 = vcombine.high %v248_v63, %v248_v63  ;;  %v264_v9 = vrot.slane %v248_v63, %v7650_v16  ;;  %v271_v10 = vrot.slane %v249_v0, %v7650_v16 }
  0x1c   :  { %v279_v11 = vcombine.high %v257_v3, %v257_v3  ;;  %v286_v15 = vrot.slane %v257_v3, %v7657_v20  ;;  %v152_v62 = vsel %vm151_vm2, %v143_v61, 0.0 }
  0x1d   :  { %7137 = vmatmul.mubr.f32.vlgmr.msra.gmra.mxu1 %v7665_v25  ;;  %v278_v18 = vrot.slane %v250_v8, %v7650_v16  ;;  %v280_v19 = vcombine.high %v264_v9, %v264_v9  ;;  %v281_v22 = vcombine.high %v271_v10, %v271_v10  ;;  %v290_v23 = vrot.slane %v271_v10, %v7657_v20 }
  0x1e   :  { %7145 = vmatpush3.msk.msra.mxu1 %vm151_vm2, %v7687_v40  ;;  %7146 = vmatprep.mubr.msk.f32.mxu1 %vm7585_vm0, %v7583_v4  ;;  %v294_v26 = vrot.slane %v279_v11, %v7657_v20  ;;  %v302_v27 = vrot.slane %v264_v9, %v7657_v20  ;;  %v323_v28 = vmul.f32 %v7687_v40, %v286_v15  ;;  %v153_v63 = vrot.slane %v152_v62, 4 }
  0x1f   :  { %7154 = vmatprep.subr.mxu1 %v7583_v4  ;;  %v282_v29 = vcombine.high %v278_v18, %v278_v18  ;;  %v298_v30 = vrot.slane %v281_v22, %v7657_v20  ;;  %v306_v16 = vrot.slane %v278_v18, %v7657_v20  ;;  %v310_v31 = vrot.slane %v280_v19, %v7657_v20 }
  0x20   :  { %v324_v33 = vmul.f32 %v7766_v12, %v290_v23  ;;  %v325_v34 = vmul.f32 %v7771_v13, %v294_v26  ;;  %v331_v35 = vsel %vm151_vm2, %v323_v28, 0.0  ;;  %v327_v41 = vmul.f32 %v7782_v24, %v302_v27 }
  0x21   :  { %7147 = vmatmul.mubr.f32.vlgmr.msra.gmra.mxu1 %v7652_v17  ;;  %v314_v38 = vrot.slane %v282_v29, %v7657_v20  ;;  %v326_v39 = vmul.f32 %v7774_v14, %v298_v30  ;;  %v328_v48 = vmul.f32 %v7802_v36, %v306_v16  ;;  %v329_v50 = vmul.f32 %v7813_v44, %v310_v31 }
  0x22   :  { %7156 = vmatprep.mubr.msk.f32.mxu1 %vm7585_vm0, %v7583_v4  ;;  %v332_v42 = vsel %vm151_vm2, %v324_v33, 0.0  ;;  %v334_v43 = vsel %vm151_vm2, %v325_v34, 0.0  ;;  %v338_v51 = vsel %vm151_vm2, %v327_v41, 0.0  ;;  %v154_v0 = vadd.f32 %v153_v63, %v152_v62 }
  0x23   :  { %v330_v45 = vmul.f32 %v7794_v32, %v314_v38  ;;  %v333_v47 = vadd.f32 %v332_v42, %v331_v35  ;;  %v336_v20 = vsel %vm151_vm2, %v326_v39, 0.0  ;;  %v340_v53 = vsel %vm151_vm2, %v328_v48, 0.0 }
  0x24   :  { %v342_v46 = vsel %vm151_vm2, %v329_v50, 0.0  ;;  %v155_v8 = vrot.slane %v154_v0, 2  ;;  %v7843_v50 = vand.u32 4294901760, %v7715_v56 }
  0x25   :  { %v335_v49 = vadd.f32 %v334_v43, %v333_v47  ;;  %v344_v57 = vsel %vm151_vm2, %v330_v45, 0.0 }
  0x26   :  { %v156_v22 = vadd.f32 %v155_v8, %v154_v0 }
  0x27   :  { %v337_v52 = vadd.f32 %v336_v20, %v335_v49 }
  0x28   :  { %v157_v30 = vrot.slane %v156_v22, 1 }
  0x29   :  { %v339_v54 = vadd.f32 %v338_v51, %v337_v52  ;;  %v7849_v52 = vsub.f32 %v7715_v56, %v7843_v50 }
  0x2a   :  { %v158_v39 = vadd.f32 %v157_v30, %v156_v22 }
  0x2b   :  { %v341_v55 = vadd.f32 %v340_v53, %v339_v54  ;;  %v7852_v53 = vand.u32 4294901760, %v7849_v52 }
  0x2d   :  { %v343_v58 = vadd.f32 %v342_v46, %v341_v55  ;;  %v912_v54 = vsub.f32 %v7849_v52, %v7852_v53 }
  0x2f   :  { %v345_v59 = vadd.f32 %v344_v57, %v343_v58  ;;  %v7857_v57 = vand.u32 4294901760, %v912_v54 }
  0x7e   :  { %v211_v3 = vpop.permute.xlu0 %210 }
  0x7f   :  { %v213_v5 = vmul.f32 %v7687_v40, %v211_v3  ;;  %v7829_v6 = vadd.f32 %v211_v3, %v23_v60 }
  0x81   :  { %v214_v9 = vsel %vm151_vm2, %v213_v5, 0.0  ;;  %v827_v10 = vsel %vm151_vm2, %v7829_v6, -inf }
  0x82   :  { %v215_v11 = vrot.slane %v214_v9, 4  ;;  %v828_v15 = vrot.slane %v827_v10, 4  ;;  %v7834_v18 = vpop.permute.xlu0 %348 }
  0x83   :  { %v351_v19 = vmul.f32 %v7834_v18, %v345_v59  ;;  %v1302_v59 = vsel %vm151_vm2, %v7766_v12, 0 }
  0x84   :  { %v216_v23 = vadd.f32 %v215_v11, %v214_v9  ;;  %v829_v26 = vmax.f32 %v827_v10, %v828_v15  ;;  %v1412_v61 = vsub.f32 %v1302_v59, %v1302_v59  ;;  %v7918_v10 = vld [vmem:[%s8417_s0 + $0x8] sm:$0x3f] }
  0x85   :  { %v352_v27 = vsel %vm151_vm2, %v351_v19, 0.0  ;;  %v144_v15 = vmul.f32 %v7766_v12, %v7918_v10 }
  0x86   :  { %v217_v40 = vrot.slane %v216_v23, 2  ;;  %v830_v28 = vrot.slane %v829_v26, 2  ;;  %v353_v29 = vrot.slane %v352_v27, 4  ;;  %v1413_v0 = vand.u32 4294901760, %v1412_v61 }
  0x88   :  { %v218_v16 = vadd.f32 %v217_v40, %v216_v23  ;;  %v831_v31 = vmax.f32 %v829_v26, %v830_v28  ;;  %v354_v33 = vadd.f32 %v353_v29, %v352_v27  ;;  %v1414_v3 = vsub.f32 %v1412_v61, %v1413_v0 }
  0x89   :  { %v159_v23 = vsel %vm151_vm2, %v144_v15, 0.0 }
  0x8a   :  { %v219_v34 = vrot.slane %v218_v16, 1  ;;  %v832_v35 = vrot.slane %v831_v31, 1  ;;  %v355_v38 = vrot.slane %v354_v33, 2  ;;  %v1415_v5 = vand.u32 4294901760, %v1414_v3 }
  0x8b   :  { %v160_v29 = vrot.slane %v159_v23, 4 }
  0x8c   :  { %v220_v41 = vadd.f32 %v219_v34, %v218_v16  ;;  %v7838_v42 = vmax.f32 %v831_v31, %v832_v35  ;;  %v356_v43 = vadd.f32 %v355_v38, %v354_v33 }
  0x8d   :  { %v161_v34 = vadd.f32 %v160_v29, %v159_v23  ;;  %v7932_v23 = vld [vmem:[%s8417_s0 + $0x10] sm:$0x3f] }
  0x8e   :  { %v834_v45 = vsub.f32 %v7829_v6, %v7838_v42  ;;  %v357_v47 = vrot.slane %v356_v43, 1  ;;  %v221_v48 = vadd.f32 %v220_v41, %v158_v39 }
  0x90   :  { %v835_v20 = vmul.f32 1.442695, %v834_v45  ;;  %v358_v49 = vadd.f32 %v357_v47, %v356_v43  ;;  %v162_v43 = vrot.slane %v161_v34, 2 }
  0x92   :  { %7549 = vpow2.f32 %v835_v20  ;;  %v7845_v51 = vadd.f32 %v358_v49, %v221_v48  ;;  %v163_v20 = vadd.f32 %v162_v43, %v161_v34 }
  0x9f   :  { %v7550_v46 = vpop.eup %7549 }
  0xa0   :  { %v841_v55 = vsel %vm151_vm2, %v7550_v46, 0  ;;  %v164_v46 = vrot.slane %v163_v20, 1 }
  0xa1   :  { %v874_v58 = vand.u32 4294901760, %v841_v55 }
  0xa2   :  { %v165_v59 = vadd.f32 %v164_v46, %v163_v20 }
  0xa3   :  { %7150 = vmatpush3.msra.mxu0 %v874_v58  ;;  %v951_v60 = vsub.f32 %v841_v55, %v874_v58 }
  0xa4   :  { %7152 = vmatmul.mubr.f32.vlgmr.msra.gmra.mxu0 %v7857_v57  ;;  %7159 = vmatprep.subr.mxu0 %v7583_v4 }
  0xa5   :  { %7160 = vmatpush3.msra.mxu0 %v951_v60  ;;  %7161 = vmatprep.mubr.msk.f32.mxu0 %vm7585_vm0, %v7583_v4  ;;  %v952_v56 = vand.u32 4294901760, %v951_v60 }
  0xa6   :  { %7169 = vmatprep.subr.mxu0 %v7583_v4 }
  0xa7   :  { %v953_v62 = vsub.f32 %v951_v60, %v952_v56 }
  0xa8   :  { %7162 = vmatmul.mubr.f32.vlgmr.msra.gmra.mxu0 %v7849_v52 }
  0xa9   :  { %7170 = vmatpush3.msra.mxu0 %v952_v56  ;;  %v954_v63 = vand.u32 4294901760, %v953_v62  ;;  %7171 = vmatprep.mubr.msk.f32.mxu0 %vm7585_vm0, %v7583_v4 }
  0xaa   :  { %7179 = vmatprep.subr.mxu0 %v7583_v4 }
  0xab   :  { %7155 = vmatpush3.msra.mxu1 %v954_v63 }
  0xac   :  { %7157 = vmatmul.mubr.f32.vlgmr.msra.gmra.mxu1 %v7843_v50  ;;  %7164 = vmatprep.subr.mxu1 %v7583_v4 }
  0xad   :  { %7165 = vmatpush3.msra.mxu1 %v874_v58  ;;  %7166 = vmatprep.mubr.msk.f32.mxu1 %vm7585_vm0, %v7583_v4 }
  0xae   :  { %7174 = vmatprep.subr.mxu1 %v7583_v4  ;;  %7172 = vmatmul.mubr.f32.vlgmr.msra.gmra.mxu0 %v7843_v50 }
  0xaf   :  { %7180 = vmatpush3.msk.msra.mxu0 %vm151_vm2, %v7766_v12  ;;  %7181 = vmatprep.mubr.msk.f32.mxu0 %vm7585_vm0, %v7583_v4 }
  0xb0   :  { %7167 = vmatmul.mubr.f32.vlgmr.msra.gmra.mxu1 %v7852_v53  ;;  %7189 = vmatprep.subr.mxu0 %v7583_v4 }
  0xb1   :  { %7175 = vmatpush3.msra.mxu1 %v874_v58  ;;  %7176 = vmatprep.mubr.msk.f32.mxu1 %vm7585_vm0, %v7583_v4 }
  0xb2   :  { %7182 = vmatmul.mubr.f32.vlgmr.msra.gmra.mxu0 %v7682_v37  ;;  %7184 = vmatprep.subr.mxu1 %v7583_v4 }
  0xb3   :  { %7190 = vmatpush3.msra.mxu0 %v1412_v61  ;;  %7191 = vmatprep.mubr.msk.f32.mxu0 %vm7585_vm0, %v7583_v4 }
  0xb4   :  { %7177 = vmatmul.mubr.f32.vlgmr.msra.gmra.mxu1 %v7843_v50  ;;  %7199 = vmatprep.subr.mxu0 %v7583_v4 }
  0xb5   :  { %7185 = vmatpush3.msra.mxu1 %v1415_v5  ;;  %7186 = vmatprep.mubr.msk.f32.mxu1 %vm7585_vm0, %v7583_v4 }
  0xb6   :  { %7192 = vmatmul.mubr.f32.vlgmr.msra.gmra.mxu0 %v7660_v21  ;;  %7194 = vmatprep.subr.mxu1 %v7583_v4 }
  0xb7   :  { %7200 = vmatpush3.msra.mxu0 %v1413_v0  ;;  %7201 = vmatprep.mubr.msk.f32.mxu0 %vm7585_vm0, %v7583_v4 }
  0xb8   :  { %7187 = vmatmul.mubr.f32.vlgmr.msra.gmra.mxu1 %v7652_v17  ;;  %7209 = vmatprep.subr.mxu0 %v7583_v4 }
  0xb9   :  { %7195 = vmatpush3.msk.msra.mxu1 %vm151_vm2, %v7766_v12  ;;  %7196 = vmatprep.mubr.msk.f32.mxu1 %vm7585_vm0, %v7583_v4 }
  0xba   :  { %7202 = vmatmul.mubr.f32.vlgmr.msra.gmra.mxu0 %v7652_v17  ;;  %7204 = vmatprep.subr.mxu1 %v7583_v4 }
  0xbb   :  { %7211 = vmatprep.mubr.msk.f32.mxu0 %vm7585_vm0, %v7583_v4 }
  0xbc   :  { %7197 = vmatmul.mubr.f32.vlgmr.msra.gmra.mxu1 %v7665_v25 }
  0xbd   :  { %7205 = vmatpush3.msk.msra.mxu1 %vm151_vm2, %v7766_v12  ;;  %7206 = vmatprep.mubr.msk.f32.mxu1 %vm7585_vm0, %v7583_v4 }
  0xbe   :  { %7214 = vmatprep.subr.mxu1 %v7583_v4 }
  0xc0   :  { %7207 = vmatmul.mubr.f32.vlgmr.msra.gmra.mxu1 %v7652_v17 }
  0xc1   :  { %7216 = vmatprep.mubr.msk.f32.mxu1 %vm7585_vm0, %v7583_v4 }
  0xd0   :  { %v442_v8 = vpop.f32.mrf.mxu0 }
  0xd2   :  { %v7123_v9 = vpop.f32.mrf.mxu0 }
  0xd4   :  { %v592_v11 = vpop.f32.mrf.mxu0 }
  0xd6   :  { %v7133_v19 = vpop.f32.mrf.mxu0 }
  0xd8   :  { %v740_v22 = vpop.f32.mrf.mxu0 }
  0xd9   :  { %v518_v26 = vpop.f32.mrf.mxu1 }
  0xda   :  { %v519_v27 = vadd.f32 %v518_v26, %v442_v8  ;;  %v7143_v40 = vpop.f32.mrf.mxu0 }
  0xdb   :  { %v7128_v28 = vpop.f32.mrf.mxu1 }
  0xdc   :  { %v593_v30 = vadd.f32 %v592_v11, %v519_v27  ;;  %v145_v28 = vmul.f32 %v7771_v13, %v7932_v23 }
  0xdd   :  { %v666_v16 = vpop.f32.mrf.mxu1 }
  0xde   :  { %v667_v31 = vadd.f32 %v666_v16, %v593_v30  ;;  %v166_v34 = vsel %vm151_vm2, %v145_v28, 0.0 }
  0xdf   :  { %v7138_v33 = vpop.f32.mrf.mxu1 }
  0xe0   :  { %v741_v35 = vadd.f32 %v740_v22, %v667_v31 }
  0xe1   :  { %v812_v38 = vpop.f32.mrf.mxu1 }
  0xe2   :  { %v813_v39 = vadd.f32 %v812_v38, %v741_v35 }
  0xe3   :  { %v7148_v41 = vpop.f32.mrf.mxu1 }
  0xe4   :  { %v816_v45 = vmul.f32 %v7766_v12, %v813_v39 }
  0xe6   :  { %v817_v47 = vsel %vm151_vm2, %v816_v45, 0.0  ;;  %v167_v45 = vrot.slane %v166_v34, 4 }
  0xe7   :  { %v818_v48 = vrot.slane %v817_v47, 4 }
  0xe9   :  { %v819_v49 = vadd.f32 %v818_v48, %v817_v47 }
  0xeb   :  { %v820_v54 = vrot.slane %v819_v49, 2 }
  0xed   :  { %v821_v55 = vadd.f32 %v820_v54, %v819_v49  ;;  %v1297_v54 = vsub.s32 1, %v7631_v7 }
  0xef   :  { %v822_v58 = vrot.slane %v821_v55, 1 }
  0xf1   :  { %v823_v60 = vadd.f32 %v822_v58, %v821_v55  ;;  %v168_v55 = vadd.f32 %v167_v45, %v166_v34  ;;  %v7940_v58 = vsel %vm1293_vm12, 1, %v7582_v1 }
  0xf3   :  { %v824_v56 = vadd.f32 %v823_v60, %v165_v59 }
  0xf5   :  { %v825_v61 = vmul.f32 %v824_v56, %v7625_v2 }
  0xf7   :  { %v7927_v62 = vadd.f32 %v825_v61, %v7845_v51  ;;  %v1298_v61 = vrot.slane %v7940_v58, %v1297_v54 }
  0xf9   :  { %vm1299_vm13 = vcmp.eq.s32.totalorder %v1298_v61, 1 }
 0x164   :  { %v915_v63 = vpop.f32.mrf.mxu0 }
 0x166   :  { %v7153_v0 = vpop.f32.mrf.mxu0 }
 0x167   :  { %v169_v0 = vrot.slane %v168_v55, 2 }
 0x168   :  { %v1065_v12 = vpop.f32.mrf.mxu0 }
 0x169   :  { %v170_v1 = vadd.f32 %v169_v0, %v168_v55 }
 0x16a   :  { %v7163_v3 = vpop.f32.mrf.mxu0 }
 0x16c   :  { %v991_v5 = vpop.f32.mrf.mxu1 }
 0x16d   :  { %v992_v8 = vadd.f32 %v991_v5, %v915_v63  ;;  %v1289_v5 = vadd.f32 %v7838_v42, %v7918_v10 }
 0x16e   :  { %v7158_v9 = vpop.f32.mrf.mxu1  ;;  %v1213_v11 = vpop.f32.mrf.mxu0 }
 0x16f   :  { %v1066_v15 = vadd.f32 %v1065_v12, %v992_v8 }
 0x170   :  { %v1139_v19 = vpop.f32.mrf.mxu1  ;;  %v7173_v22 = vpop.f32.mrf.mxu0 }
 0x171   :  { %v1140_v26 = vadd.f32 %v1139_v19, %v1066_v15 }
 0x172   :  { %v7168_v27 = vpop.f32.mrf.mxu1  ;;  %v1376_v51 = vpop.f32.mrf.mxu0 }
 0x173   :  { %v1214_v40 = vadd.f32 %v1213_v11, %v1140_v26 }
 0x174   :  { %v1285_v29 = vpop.f32.mrf.mxu1  ;;  %v7183_v30 = vpop.f32.mrf.mxu0 }
 0x175   :  { %v1286_v16 = vadd.f32 %v1285_v29, %v1214_v40 }
 0x176   :  { %v7178_v31 = vpop.f32.mrf.mxu1  ;;  %v1526_v33 = vpop.f32.mrf.mxu0 }
 0x177   :  { %7551 = vlog2.f32 %v1286_v16 }
 0x178   :  { %v1452_v35 = vpop.f32.mrf.mxu1  ;;  %v7193_v38 = vpop.f32.mrf.mxu0 }
 0x179   :  { %v1453_v39 = vadd.f32 %v1452_v35, %v1376_v51  ;;  %v171_v51 = vrot.slane %v170_v1, 1 }
 0x17a   :  { %v7188_v41 = vpop.f32.mrf.mxu1  ;;  %v1674_v43 = vpop.f32.mrf.mxu0 }
 0x17b   :  { %v1527_v47 = vadd.f32 %v1526_v33, %v1453_v39  ;;  %v172_v10 = vadd.f32 %v171_v51, %v170_v1 }
 0x17c   :  { %v1600_v48 = vpop.f32.mrf.mxu1  ;;  %v7203_v20 = vpop.f32.mrf.mxu0 }
 0x17d   :  { %v1601_v49 = vadd.f32 %v1600_v48, %v1527_v47  ;;  %v2234_v20 = vsel %vm151_vm2, %v7771_v13, 0 }
 0x17e   :  { %v7198_v46 = vpop.f32.mrf.mxu1  ;;  %v2344_v54 = vsub.f32 %v2234_v20, %v2234_v20  ;;  %v2229_v20 = vsub.s32 2, %v7631_v7 }
 0x17f   :  { %v1675_v59 = vadd.f32 %v1674_v43, %v1601_v49 }
 0x180   :  { %v1746_v60 = vpop.f32.mrf.mxu1 }
 0x181   :  { %v1747_v56 = vadd.f32 %v1746_v60, %v1675_v59  ;;  %v2345_v59 = vand.u32 4294901760, %v2344_v54 }
 0x182   :  { %v7208_v63 = vpop.f32.mrf.mxu1 }
 0x183   :  { %v1750_v12 = vmul.f32 %v7771_v13, %v1747_v56  ;;  %v2346_v60 = vsub.f32 %v2344_v54, %v2345_v59 }
 0x184   :  { %v7552_v3 = vpop.eup %7551 }
 0x185   :  { %v1291_v8 = vmul.f32 0.6931472, %v7552_v3  ;;  %v1751_v9 = vsel %vm151_vm2, %v1750_v12, 0.0  ;;  %v2347_v56 = vand.u32 4294901760, %v2346_v60 }
 0x186   :  { %v1752_v11 = vrot.slane %v1751_v9, 4 }
 0x187   :  { %v1292_v15 = vadd.f32 %v1291_v8, %v1289_v5 }
 0x188   :  { %v1753_v19 = vadd.f32 %v1752_v11, %v1751_v9 }
 0x189   :  { %v7948_v22 = vsel %vm1299_vm13, %v1292_v15, %v7829_v6  ;;  %v8020_v15 = vld [vmem:[%s8417_s0 + $0x18] sm:$0x3f] }
 0x18a   :  { %v1764_v26 = vsel %vm151_vm2, %v7948_v22, -inf  ;;  %v1754_v27 = vrot.slane %v1753_v19, 2 }
 0x18b   :  { %v1765_v40 = vrot.slane %v1764_v26, 4 }
 0x18c   :  { %v1755_v28 = vadd.f32 %v1754_v27, %v1753_v19 }
 0x18d   :  { %v1766_v29 = vmax.f32 %v1764_v26, %v1765_v40  ;;  %v146_v40 = vmul.f32 %v7774_v14, %v8020_v15 }
 0x18e   :  { %v1756_v42 = vrot.slane %v1755_v28, 1 }
 0x18f   :  { %v1767_v30 = vrot.slane %v1766_v29, 2 }
 0x190   :  { %v1757_v16 = vadd.f32 %v1756_v42, %v1755_v28 }
 0x191   :  { %v1768_v31 = vmax.f32 %v1766_v29, %v1767_v30 }
 0x192   :  { %v1758_v33 = vadd.f32 %v1757_v16, %v172_v10  ;;  %v173_v16 = vsel %vm151_vm2, %v146_v40, 0.0 }
 0x193   :  { %v1769_v34 = vrot.slane %v1768_v31, 1 }
 0x194   :  { %v1759_v35 = vmul.f32 %v1758_v33, %v7625_v2 }
 0x195   :  { %v7953_v38 = vmax.f32 %v1768_v31, %v1769_v34 }
 0x196   :  { %v1761_v6 = vrot.slane %v1759_v35, 1 }
 0x197   :  { %v1771_v39 = vsub.f32 %v7948_v22, %v7953_v38 }
 0x198   :  { %v7958_v41 = vadd.f32 %v1761_v6, %v7927_v62 }
 0x199   :  { %v1772_v43 = vmul.f32 1.442695, %v1771_v39  ;;  %v174_v39 = vrot.slane %v173_v16, 4 }
 0x19b   :  { %7553 = vpow2.f32 %v1772_v43 }
 0x1a8   :  { %v7554_v45 = vpop.eup %7553 }
 0x1a9   :  { %v1775_v47 = vsel %vm151_vm2, %v7554_v45, 0 }
 0x1aa   :  { %v1808_v48 = vand.u32 4294901760, %v1775_v47 }
 0x1ac   :  { %7210 = vmatpush3.msra.mxu0 %v1808_v48  ;;  %v1885_v49 = vsub.f32 %v1775_v47, %v1808_v48 }
 0x1ad   :  { %7212 = vmatmul.mubr.f32.vlgmr.msra.gmra.mxu0 %v7857_v57  ;;  %7219 = vmatprep.subr.mxu0 %v7583_v4 }
 0x1ae   :  { %7220 = vmatpush3.msra.mxu0 %v1885_v49  ;;  %7221 = vmatprep.mubr.msk.f32.mxu0 %vm7585_vm0, %v7583_v4  ;;  %v1886_v62 = vand.u32 4294901760, %v1885_v49 }
 0x1af   :  { %7229 = vmatprep.subr.mxu0 %v7583_v4 }
 0x1b0   :  { %v1887_v46 = vsub.f32 %v1885_v49, %v1886_v62 }
 0x1b1   :  { %7222 = vmatmul.mubr.f32.vlgmr.msra.gmra.mxu0 %v7849_v52 }
 0x1b2   :  { %7230 = vmatpush3.msra.mxu0 %v1886_v62  ;;  %v1888_v55 = vand.u32 4294901760, %v1887_v46  ;;  %7231 = vmatprep.mubr.msk.f32.mxu0 %vm7585_vm0, %v7583_v4  ;;  %v175_v62 = vadd.f32 %v174_v39, %v173_v16 }
 0x1b3   :  { %7239 = vmatprep.subr.mxu0 %v7583_v4 }
 0x1b4   :  { %7215 = vmatpush3.msra.mxu1 %v1888_v55 }
 0x1b5   :  { %7217 = vmatmul.mubr.f32.vlgmr.msra.gmra.mxu1 %v7843_v50  ;;  %7224 = vmatprep.subr.mxu1 %v7583_v4 }
 0x1b6   :  { %7225 = vmatpush3.msra.mxu1 %v1808_v48  ;;  %7226 = vmatprep.mubr.msk.f32.mxu1 %vm7585_vm0, %v7583_v4 }
 0x1b7   :  { %7234 = vmatprep.subr.mxu1 %v7583_v4  ;;  %7232 = vmatmul.mubr.f32.vlgmr.msra.gmra.mxu0 %v7843_v50 }
 0x1b8   :  { %7240 = vmatpush3.msk.msra.mxu0 %vm151_vm2, %v7771_v13  ;;  %7241 = vmatprep.mubr.msk.f32.mxu0 %vm7585_vm0, %v7583_v4 }
 0x1b9   :  { %7227 = vmatmul.mubr.f32.vlgmr.msra.gmra.mxu1 %v7852_v53  ;;  %7249 = vmatprep.subr.mxu0 %v7583_v4 }
 0x1ba   :  { %7235 = vmatpush3.msra.mxu1 %v1808_v48  ;;  %7236 = vmatprep.mubr.msk.f32.mxu1 %vm7585_vm0, %v7583_v4 }
 0x1bb   :  { %7242 = vmatmul.mubr.f32.vlgmr.msra.gmra.mxu0 %v7682_v37  ;;  %7244 = vmatprep.subr.mxu1 %v7583_v4 }
 0x1bc   :  { %7250 = vmatpush3.msra.mxu0 %v2344_v54  ;;  %7251 = vmatprep.mubr.msk.f32.mxu0 %vm7585_vm0, %v7583_v4 }
 0x1bd   :  { %7237 = vmatmul.mubr.f32.vlgmr.msra.gmra.mxu1 %v7843_v50  ;;  %7259 = vmatprep.subr.mxu0 %v7583_v4 }
 0x1be   :  { %7245 = vmatpush3.msra.mxu1 %v2347_v56  ;;  %7246 = vmatprep.mubr.msk.f32.mxu1 %vm7585_vm0, %v7583_v4  ;;  %v176_v56 = vrot.slane %v175_v62, 2 }
 0x1bf   :  { %7252 = vmatmul.mubr.f32.vlgmr.msra.gmra.mxu0 %v7660_v21  ;;  %7254 = vmatprep.subr.mxu1 %v7583_v4 }
 0x1c0   :  { %7260 = vmatpush3.msra.mxu0 %v2345_v59  ;;  %7261 = vmatprep.mubr.msk.f32.mxu0 %vm7585_vm0, %v7583_v4  ;;  %v2230_v59 = vrot.slane %v7940_v58, %v2229_v20 }
 0x1c1   :  { %7247 = vmatmul.mubr.f32.vlgmr.msra.gmra.mxu1 %v7652_v17  ;;  %7269 = vmatprep.subr.mxu0 %v7583_v4 }
 0x1c2   :  { %7255 = vmatpush3.msk.msra.mxu1 %vm151_vm2, %v7771_v13  ;;  %7256 = vmatprep.mubr.msk.f32.mxu1 %vm7585_vm0, %v7583_v4  ;;  %vm2231_vm14 = vcmp.eq.s32.totalorder %v2230_v59, 1 }
 0x1c3   :  { %7262 = vmatmul.mubr.f32.vlgmr.msra.gmra.mxu0 %v7652_v17  ;;  %7264 = vmatprep.subr.mxu1 %v7583_v4 }
 0x1c4   :  { %7271 = vmatprep.mubr.msk.f32.mxu0 %vm7585_vm0, %v7583_v4 }
 0x1c5   :  { %7257 = vmatmul.mubr.f32.vlgmr.msra.gmra.mxu1 %v7665_v25 }
 0x1c6   :  { %7265 = vmatpush3.msk.msra.mxu1 %vm151_vm2, %v7771_v13  ;;  %7266 = vmatprep.mubr.msk.f32.mxu1 %vm7585_vm0, %v7583_v4 }
 0x1c7   :  { %7274 = vmatprep.subr.mxu1 %v7583_v4 }
 0x1c9   :  { %7267 = vmatmul.mubr.f32.vlgmr.msra.gmra.mxu1 %v7652_v17 }
 0x1ca   :  { %7276 = vmatprep.mubr.msk.f32.mxu1 %vm7585_vm0, %v7583_v4 }
 0x26d   :  { %v1849_v61 = vpop.f32.mrf.mxu0 }
 0x26f   :  { %v7213_v63 = vpop.f32.mrf.mxu0 }
 0x271   :  { %v1999_v0 = vpop.f32.mrf.mxu0 }
 0x273   :  { %v7223_v12 = vpop.f32.mrf.mxu0 }
 0x275   :  { %v1925_v3 = vpop.f32.mrf.mxu1 }
 0x276   :  { %v1926_v5 = vadd.f32 %v1925_v3, %v1849_v61 }
 0x277   :  { %v7218_v8 = vpop.f32.mrf.mxu1  ;;  %v2147_v9 = vpop.f32.mrf.mxu0 }
 0x278   :  { %v2000_v11 = vadd.f32 %v1999_v0, %v1926_v5  ;;  %v2223_v0 = vadd.f32 %v7953_v38, %v7932_v23  ;;  %v177_v8 = vadd.f32 %v176_v56, %v175_v62 }
 0x279   :  { %v2073_v13 = vpop.f32.mrf.mxu1  ;;  %v7233_v1 = vpop.f32.mrf.mxu0 }
 0x27a   :  { %v2074_v19 = vadd.f32 %v2073_v13, %v2000_v11 }
 0x27b   :  { %v7228_v26 = vpop.f32.mrf.mxu1  ;;  %v2308_v27 = vpop.f32.mrf.mxu0 }
 0x27c   :  { %v2148_v51 = vadd.f32 %v2147_v9, %v2074_v19  ;;  %v178_v26 = vrot.slane %v177_v8, 1 }
 0x27d   :  { %v2219_v28 = vpop.f32.mrf.mxu1  ;;  %v7243_v29 = vpop.f32.mrf.mxu0 }
 0x27e   :  { %v2220_v42 = vadd.f32 %v2219_v28, %v2148_v51  ;;  %v179_v38 = vadd.f32 %v178_v26, %v177_v8 }
 0x27f   :  { %v7238_v10 = vpop.f32.mrf.mxu1  ;;  %v2458_v30 = vpop.f32.mrf.mxu0 }
 0x280   :  { %7555 = vlog2.f32 %v2220_v42 }
 0x281   :  { %v2384_v31 = vpop.f32.mrf.mxu1  ;;  %v7253_v33 = vpop.f32.mrf.mxu0 }
 0x282   :  { %v2385_v34 = vadd.f32 %v2384_v31, %v2308_v27 }
 0x283   :  { %v7248_v35 = vpop.f32.mrf.mxu1  ;;  %v2606_v6 = vpop.f32.mrf.mxu0 }
 0x284   :  { %v2459_v43 = vadd.f32 %v2458_v30, %v2385_v34 }
 0x285   :  { %v2532_v45 = vpop.f32.mrf.mxu1  ;;  %v7263_v47 = vpop.f32.mrf.mxu0 }
 0x286   :  { %v2533_v48 = vadd.f32 %v2532_v45, %v2459_v43  ;;  %v3166_v45 = vsel %vm151_vm2, %v7774_v14, 0 }
 0x287   :  { %v7258_v49 = vpop.f32.mrf.mxu1  ;;  %v3276_v47 = vsub.f32 %v3166_v45, %v3166_v45 }
 0x288   :  { %v2607_v54 = vadd.f32 %v2606_v6, %v2533_v48 }
 0x289   :  { %v2678_v46 = vpop.f32.mrf.mxu1  ;;  %v3277_v49 = vand.u32 4294901760, %v3276_v47 }
 0x28a   :  { %v2679_v55 = vadd.f32 %v2678_v46, %v2607_v54 }
 0x28b   :  { %v7268_v60 = vpop.f32.mrf.mxu1  ;;  %v3278_v62 = vsub.f32 %v3276_v47, %v3277_v49 }
 0x28c   :  { %v2682_v61 = vmul.f32 %v7774_v14, %v2679_v55 }
 0x28d   :  { %v7556_v63 = vpop.eup %7555  ;;  %v3279_v54 = vand.u32 4294901760, %v3278_v62 }
 0x28e   :  { %v2225_v12 = vmul.f32 0.6931472, %v7556_v63  ;;  %v2683_v3 = vsel %vm151_vm2, %v2682_v61, 0.0 }
 0x28f   :  { %v2684_v5 = vrot.slane %v2683_v3, 4 }
 0x290   :  { %v2226_v9 = vadd.f32 %v2225_v12, %v2223_v0 }
 0x291   :  { %v2685_v11 = vadd.f32 %v2684_v5, %v2683_v3  ;;  %v8104_v5 = vld [vmem:[%s8417_s0 + $0x20] sm:$0x3f] }
 0x292   :  { %v8032_v13 = vsel %vm2231_vm14, %v2226_v9, %v7948_v22 }
 0x293   :  { %v2696_v1 = vsel %vm151_vm2, %v8032_v13, -inf  ;;  %v2686_v19 = vrot.slane %v2685_v11, 2 }
 0x294   :  { %v2697_v27 = vrot.slane %v2696_v1, 4 }
 0x295   :  { %v2687_v51 = vadd.f32 %v2686_v19, %v2685_v11  ;;  %v147_v19 = vmul.f32 %v7782_v24, %v8104_v5 }
 0x296   :  { %v2698_v40 = vmax.f32 %v2696_v1, %v2697_v27 }
 0x297   :  { %v2688_v23 = vrot.slane %v2687_v51, 1 }
 0x298   :  { %v2699_v28 = vrot.slane %v2698_v40, 2 }
 0x299   :  { %v2689_v29 = vadd.f32 %v2688_v23, %v2687_v51 }
 0x29a   :  { %v2700_v42 = vmax.f32 %v2698_v40, %v2699_v28 }
 0x29b   :  { %v2690_v10 = vadd.f32 %v2689_v29, %v179_v38  ;;  %v180_v38 = vsel %vm151_vm2, %v147_v19, 0.0 }
 0x29c   :  { %v2701_v30 = vrot.slane %v2700_v42, 1 }
 0x29d   :  { %v2691_v16 = vmul.f32 %v2690_v10, %v7625_v2 }
 0x29e   :  { %v8037_v31 = vmax.f32 %v2700_v42, %v2701_v30 }
 0x29f   :  { %v2693_v22 = vrot.slane %v2691_v16, 2  ;;  %v181_v16 = vrot.slane %v180_v38, 4 }
 0x2a0   :  { %v2703_v33 = vsub.f32 %v8032_v13, %v8037_v31 }
 0x2a1   :  { %v8042_v34 = vadd.f32 %v2693_v22, %v7958_v41  ;;  %v182_v45 = vadd.f32 %v181_v16, %v180_v38 }
 0x2a2   :  { %v2704_v35 = vmul.f32 1.442695, %v2703_v33 }
 0x2a4   :  { %7557 = vpow2.f32 %v2704_v35 }
 0x2b1   :  { %v7558_v6 = vpop.eup %7557 }
 0x2b2   :  { %v2707_v39 = vsel %vm151_vm2, %v7558_v6, 0 }
 0x2b3   :  { %v2740_v43 = vand.u32 4294901760, %v2707_v39 }
 0x2b5   :  { %7270 = vmatpush3.msra.mxu0 %v2740_v43  ;;  %v2817_v2 = vsub.f32 %v2707_v39, %v2740_v43  ;;  %v3161_v39 = vsub.s32 3, %v7631_v7 }
 0x2b6   :  { %7272 = vmatmul.mubr.f32.vlgmr.msra.gmra.mxu0 %v7857_v57  ;;  %7279 = vmatprep.subr.mxu0 %v7583_v4 }
 0x2b7   :  { %7280 = vmatpush3.msra.mxu0 %v2817_v2  ;;  %7281 = vmatprep.mubr.msk.f32.mxu0 %vm7585_vm0, %v7583_v4  ;;  %v2818_v41 = vand.u32 4294901760, %v2817_v2 }
 0x2b8   :  { %7289 = vmatprep.subr.mxu0 %v7583_v4 }
 0x2b9   :  { %v2819_v48 = vsub.f32 %v2817_v2, %v2818_v41 }
 0x2ba   :  { %7282 = vmatmul.mubr.f32.vlgmr.msra.gmra.mxu0 %v7849_v52 }
 0x2bb   :  { %7290 = vmatpush3.msra.mxu0 %v2818_v41  ;;  %v2820_v20 = vand.u32 4294901760, %v2819_v48  ;;  %7291 = vmatprep.mubr.msk.f32.mxu0 %vm7585_vm0, %v7583_v4  ;;  %v3162_v48 = vrot.slane %v7940_v58, %v3161_v39 }
 0x2bc   :  { %7299 = vmatprep.subr.mxu0 %v7583_v4 }
 0x2bd   :  { %7275 = vmatpush3.msra.mxu1 %v2820_v20  ;;  %vm3163_vm15 = vcmp.eq.s32.totalorder %v3162_v48, 1 }
 0x2be   :  { %7277 = vmatmul.mubr.f32.vlgmr.msra.gmra.mxu1 %v7843_v50  ;;  %7284 = vmatprep.subr.mxu1 %v7583_v4 }
 0x2bf   :  { %7285 = vmatpush3.msra.mxu1 %v2740_v43  ;;  %7286 = vmatprep.mubr.msk.f32.mxu1 %vm7585_vm0, %v7583_v4 }
 0x2c0   :  { %7294 = vmatprep.subr.mxu1 %v7583_v4  ;;  %7292 = vmatmul.mubr.f32.vlgmr.msra.gmra.mxu0 %v7843_v50 }
 0x2c1   :  { %7300 = vmatpush3.msk.msra.mxu0 %vm151_vm2, %v7774_v14  ;;  %7301 = vmatprep.mubr.msk.f32.mxu0 %vm7585_vm0, %v7583_v4 }
 0x2c2   :  { %7287 = vmatmul.mubr.f32.vlgmr.msra.gmra.mxu1 %v7852_v53  ;;  %7309 = vmatprep.subr.mxu0 %v7583_v4 }
 0x2c3   :  { %7295 = vmatpush3.msra.mxu1 %v2740_v43  ;;  %7296 = vmatprep.mubr.msk.f32.mxu1 %vm7585_vm0, %v7583_v4 }
 0x2c4   :  { %7302 = vmatmul.mubr.f32.vlgmr.msra.gmra.mxu0 %v7682_v37  ;;  %7304 = vmatprep.subr.mxu1 %v7583_v4 }
 0x2c5   :  { %7310 = vmatpush3.msra.mxu0 %v3276_v47  ;;  %7311 = vmatprep.mubr.msk.f32.mxu0 %vm7585_vm0, %v7583_v4 }
 0x2c6   :  { %7297 = vmatmul.mubr.f32.vlgmr.msra.gmra.mxu1 %v7843_v50  ;;  %7319 = vmatprep.subr.mxu0 %v7583_v4 }
 0x2c7   :  { %7305 = vmatpush3.msra.mxu1 %v3279_v54  ;;  %7306 = vmatprep.mubr.msk.f32.mxu1 %vm7585_vm0, %v7583_v4 }
 0x2c8   :  { %7312 = vmatmul.mubr.f32.vlgmr.msra.gmra.mxu0 %v7660_v21  ;;  %7314 = vmatprep.subr.mxu1 %v7583_v4 }
 0x2c9   :  { %7320 = vmatpush3.msra.mxu0 %v3277_v49  ;;  %7321 = vmatprep.mubr.msk.f32.mxu0 %vm7585_vm0, %v7583_v4  ;;  %v183_v49 = vrot.slane %v182_v45, 2 }
 0x2ca   :  { %7307 = vmatmul.mubr.f32.vlgmr.msra.gmra.mxu1 %v7652_v17  ;;  %7329 = vmatprep.subr.mxu0 %v7583_v4 }
 0x2cb   :  { %7315 = vmatpush3.msk.msra.mxu1 %vm151_vm2, %v7774_v14  ;;  %7316 = vmatprep.mubr.msk.f32.mxu1 %vm7585_vm0, %v7583_v4 }
 0x2cc   :  { %7322 = vmatmul.mubr.f32.vlgmr.msra.gmra.mxu0 %v7652_v17  ;;  %7324 = vmatprep.subr.mxu1 %v7583_v4 }
 0x2cd   :  { %7331 = vmatprep.mubr.msk.f32.mxu0 %vm7585_vm0, %v7583_v4 }
 0x2ce   :  { %7317 = vmatmul.mubr.f32.vlgmr.msra.gmra.mxu1 %v7665_v25 }
 0x2cf   :  { %7325 = vmatpush3.msk.msra.mxu1 %vm151_vm2, %v7774_v14  ;;  %7326 = vmatprep.mubr.msk.f32.mxu1 %vm7585_vm0, %v7583_v4 }
 0x2d0   :  { %7334 = vmatprep.subr.mxu1 %v7583_v4 }
 0x2d2   :  { %7327 = vmatmul.mubr.f32.vlgmr.msra.gmra.mxu1 %v7652_v17 }
 0x2d3   :  { %7336 = vmatprep.mubr.msk.f32.mxu1 %vm7585_vm0, %v7583_v4 }
 0x376   :  { %v2781_v46 = vpop.f32.mrf.mxu0 }
 0x378   :  { %v7273_v55 = vpop.f32.mrf.mxu0 }
 0x37a   :  { %v2931_v59 = vpop.f32.mrf.mxu0 }
 0x37c   :  { %v7283_v60 = vpop.f32.mrf.mxu0 }
 0x37e   :  { %v2857_v56 = vpop.f32.mrf.mxu1 }
 0x37f   :  { %v2858_v61 = vadd.f32 %v2857_v56, %v2781_v46  ;;  %v3155_v46 = vadd.f32 %v8037_v31, %v8020_v15  ;;  %v184_v56 = vadd.f32 %v183_v49, %v182_v45 }
 0x380   :  { %v7278_v63 = vpop.f32.mrf.mxu1  ;;  %v3079_v0 = vpop.f32.mrf.mxu0 }
 0x381   :  { %v2932_v12 = vadd.f32 %v2931_v59, %v2858_v61 }
 0x382   :  { %v3005_v14 = vpop.f32.mrf.mxu1  ;;  %v7293_v3 = vpop.f32.mrf.mxu0 }
 0x383   :  { %v3006_v8 = vadd.f32 %v3005_v14, %v2932_v12  ;;  %v185_v3 = vrot.slane %v184_v56, 1 }
 0x384   :  { %v7288_v9 = vpop.f32.mrf.mxu1  ;;  %v3240_v11 = vpop.f32.mrf.mxu0 }
 0x385   :  { %v3080_v1 = vadd.f32 %v3079_v0, %v3006_v8  ;;  %v186_v31 = vadd.f32 %v185_v3, %v184_v56 }
 0x386   :  { %v3151_v26 = vpop.f32.mrf.mxu1  ;;  %v7303_v27 = vpop.f32.mrf.mxu0 }
 0x387   :  { %v3152_v51 = vadd.f32 %v3151_v26, %v3080_v1 }
 0x388   :  { %v7298_v40 = vpop.f32.mrf.mxu1  ;;  %v3390_v23 = vpop.f32.mrf.mxu0 }
 0x389   :  { %7559 = vlog2.f32 %v3152_v51 }
 0x38a   :  { %v3316_v28 = vpop.f32.mrf.mxu1  ;;  %v7313_v29 = vpop.f32.mrf.mxu0 }
 0x38b   :  { %v3317_v42 = vadd.f32 %v3316_v28, %v3240_v11 }
 0x38c   :  { %v7308_v10 = vpop.f32.mrf.mxu1  ;;  %v3538_v30 = vpop.f32.mrf.mxu0 }
 0x38d   :  { %v3391_v22 = vadd.f32 %v3390_v23, %v3317_v42 }
 0x38e   :  { %v3464_v33 = vpop.f32.mrf.mxu1  ;;  %v7323_v35 = vpop.f32.mrf.mxu0 }
 0x38f   :  { %v3465_v6 = vadd.f32 %v3464_v33, %v3391_v22  ;;  %v4098_v22 = vsel %vm151_vm2, %v7782_v24, 0 }
 0x390   :  { %v7318_v43 = vpop.f32.mrf.mxu1  ;;  %v4208_v35 = vsub.f32 %v4098_v22, %v4098_v22 }
 0x391   :  { %v3539_v2 = vadd.f32 %v3538_v30, %v3465_v6 }
 0x392   :  { %v3610_v41 = vpop.f32.mrf.mxu1  ;;  %v4209_v43 = vand.u32 4294901760, %v4208_v35 }
 0x393   :  { %v3611_v47 = vadd.f32 %v3610_v41, %v3539_v2 }
 0x394   :  { %v7328_v20 = vpop.f32.mrf.mxu1  ;;  %v4210_v45 = vsub.f32 %v4208_v35, %v4209_v43 }
 0x395   :  { %v3614_v62 = vmul.f32 %v7782_v24, %v3611_v47 }
 0x396   :  { %v7560_v54 = vpop.eup %7559  ;;  %v4211_v2 = vand.u32 4294901760, %v4210_v45 }
 0x397   :  { %v3157_v55 = vmul.f32 0.6931472, %v7560_v54  ;;  %v3615_v59 = vsel %vm151_vm2, %v3614_v62, 0.0 }
 0x398   :  { %v3616_v60 = vrot.slane %v3615_v59, 4 }
 0x399   :  { %v3158_v61 = vadd.f32 %v3157_v55, %v3155_v46 }
 0x39a   :  { %v3617_v63 = vadd.f32 %v3616_v60, %v3615_v59  ;;  %v8193_v60 = vld [vmem:[%s8417_s0 + $0x28] sm:$0x3f] }
 0x39b   :  { %v8116_v0 = vsel %vm3163_vm15, %v3158_v61, %v8032_v13  ;;  %v8123_v13 = vld [vmem:[%s8412_s2] sm:$0xff] }
 0x39c   :  { %v3628_v12 = vsel %vm151_vm2, %v8116_v0, -inf  ;;  %v3618_v14 = vrot.slane %v3617_v63, 2 }
 0x39d   :  { %v3629_v8 = vrot.slane %v3628_v12, 4 }
 0x39e   :  { %v3619_v9 = vadd.f32 %v3618_v14, %v3617_v63  ;;  %v148_v14 = vmul.f32 %v7802_v36, %v8193_v60 }
 0x39f   :  { %v3630_v11 = vmax.f32 %v3628_v12, %v3629_v8 }
 0x3a0   :  { %v3620_v15 = vrot.slane %v3619_v9, 1 }
 0x3a1   :  { %v3631_v1 = vrot.slane %v3630_v11, 2 }
 0x3a2   :  { %v3621_v19 = vadd.f32 %v3620_v15, %v3619_v9 }
 0x3a3   :  { %v3632_v26 = vmax.f32 %v3630_v11, %v3631_v1 }
 0x3a4   :  { %v3622_v27 = vadd.f32 %v3621_v19, %v186_v31  ;;  %v187_v31 = vsel %vm151_vm2, %v148_v14, 0.0 }
 0x3a5   :  { %v3633_v51 = vrot.slane %v3632_v26, 1 }
 0x3a6   :  { %v3623_v40 = vmul.f32 %v8123_v13, %v3622_v27 }
 0x3a7   :  { %v8126_v23 = vmax.f32 %v3632_v26, %v3633_v51 }
 0x3a8   :  { %v3625_v38 = vrot.slane %v3623_v40, 3  ;;  %v188_v40 = vrot.slane %v187_v31, 4 }
 0x3a9   :  { %v3635_v28 = vsub.f32 %v8116_v0, %v8126_v23 }
 0x3aa   :  { %v8131_v29 = vadd.f32 %v3625_v38, %v8042_v34  ;;  %v189_v22 = vadd.f32 %v188_v40, %v187_v31  ;;  %v5030_v40 = vsel %vm151_vm2, %v7802_v36, 0 }
 0x3ab   :  { %v3636_v42 = vmul.f32 1.442695, %v3635_v28 }
 0x3ad   :  { %7561 = vpow2.f32 %v3636_v42 }
 0x3ba   :  { %v7562_v10 = vpop.eup %7561 }
 0x3bb   :  { %v3639_v30 = vsel %vm151_vm2, %v7562_v10, 0 }
 0x3bc   :  { %v3672_v16 = vand.u32 4294901760, %v3639_v30 }
 0x3be   :  { %7330 = vmatpush3.msra.mxu0 %v3672_v16  ;;  %v3749_v33 = vsub.f32 %v3639_v30, %v3672_v16  ;;  %v4093_v30 = vsub.s32 4, %v7631_v7 }
 0x3bf   :  { %7332 = vmatmul.mubr.f32.vlgmr.msra.gmra.mxu0 %v7857_v57  ;;  %7339 = vmatprep.subr.mxu0 %v7583_v4 }
 0x3c0   :  { %7340 = vmatpush3.msra.mxu0 %v3749_v33  ;;  %7341 = vmatprep.mubr.msk.f32.mxu0 %vm7585_vm0, %v7583_v4  ;;  %v3750_v34 = vand.u32 4294901760, %v3749_v33 }
 0x3c1   :  { %7349 = vmatprep.subr.mxu0 %v7583_v4 }
 0x3c2   :  { %v3751_v6 = vsub.f32 %v3749_v33, %v3750_v34 }
 0x3c3   :  { %7342 = vmatmul.mubr.f32.vlgmr.msra.gmra.mxu0 %v7849_v52 }
 0x3c4   :  { %7350 = vmatpush3.msra.mxu0 %v3750_v34  ;;  %v3752_v39 = vand.u32 4294901760, %v3751_v6  ;;  %7351 = vmatprep.mubr.msk.f32.mxu0 %vm7585_vm0, %v7583_v4  ;;  %v4094_v6 = vrot.slane %v7940_v58, %v4093_v30 }
 0x3c5   :  { %7359 = vmatprep.subr.mxu0 %v7583_v4 }
 0x3c6   :  { %7335 = vmatpush3.msra.mxu1 %v3752_v39  ;;  %vm4095_vm1 = vcmp.eq.s32.totalorder %v4094_v6, 1 }
 0x3c7   :  { %7337 = vmatmul.mubr.f32.vlgmr.msra.gmra.mxu1 %v7843_v50  ;;  %7344 = vmatprep.subr.mxu1 %v7583_v4 }
 0x3c8   :  { %7345 = vmatpush3.msra.mxu1 %v3672_v16  ;;  %7346 = vmatprep.mubr.msk.f32.mxu1 %vm7585_vm0, %v7583_v4 }
 0x3c9   :  { %7354 = vmatprep.subr.mxu1 %v7583_v4  ;;  %7352 = vmatmul.mubr.f32.vlgmr.msra.gmra.mxu0 %v7843_v50 }
 0x3ca   :  { %7360 = vmatpush3.msk.msra.mxu0 %vm151_vm2, %v7782_v24  ;;  %7361 = vmatprep.mubr.msk.f32.mxu0 %vm7585_vm0, %v7583_v4 }
 0x3cb   :  { %7347 = vmatmul.mubr.f32.vlgmr.msra.gmra.mxu1 %v7852_v53  ;;  %7369 = vmatprep.subr.mxu0 %v7583_v4 }
 0x3cc   :  { %7355 = vmatpush3.msra.mxu1 %v3672_v16  ;;  %7356 = vmatprep.mubr.msk.f32.mxu1 %vm7585_vm0, %v7583_v4 }
 0x3cd   :  { %7362 = vmatmul.mubr.f32.vlgmr.msra.gmra.mxu0 %v7682_v37  ;;  %7364 = vmatprep.subr.mxu1 %v7583_v4 }
 0x3ce   :  { %7370 = vmatpush3.msra.mxu0 %v4208_v35  ;;  %7371 = vmatprep.mubr.msk.f32.mxu0 %vm7585_vm0, %v7583_v4 }
 0x3cf   :  { %7357 = vmatmul.mubr.f32.vlgmr.msra.gmra.mxu1 %v7843_v50  ;;  %7379 = vmatprep.subr.mxu0 %v7583_v4 }
 0x3d0   :  { %7365 = vmatpush3.msra.mxu1 %v4211_v2  ;;  %7366 = vmatprep.mubr.msk.f32.mxu1 %vm7585_vm0, %v7583_v4 }
 0x3d1   :  { %7372 = vmatmul.mubr.f32.vlgmr.msra.gmra.mxu0 %v7660_v21  ;;  %7374 = vmatprep.subr.mxu1 %v7583_v4 }
 0x3d2   :  { %7380 = vmatpush3.msra.mxu0 %v4209_v43  ;;  %7381 = vmatprep.mubr.msk.f32.mxu0 %vm7585_vm0, %v7583_v4  ;;  %v190_v43 = vrot.slane %v189_v22, 2 }
 0x3d3   :  { %7367 = vmatmul.mubr.f32.vlgmr.msra.gmra.mxu1 %v7652_v17  ;;  %7389 = vmatprep.subr.mxu0 %v7583_v4 }
 0x3d4   :  { %7375 = vmatpush3.msk.msra.mxu1 %vm151_vm2, %v7782_v24  ;;  %7376 = vmatprep.mubr.msk.f32.mxu1 %vm7585_vm0, %v7583_v4 }
 0x3d5   :  { %7382 = vmatmul.mubr.f32.vlgmr.msra.gmra.mxu0 %v7652_v17  ;;  %7384 = vmatprep.subr.mxu1 %v7583_v4 }
 0x3d6   :  { %7391 = vmatprep.mubr.msk.f32.mxu0 %vm7585_vm0, %v7583_v4 }
 0x3d7   :  { %7377 = vmatmul.mubr.f32.vlgmr.msra.gmra.mxu1 %v7665_v25 }
 0x3d8   :  { %7385 = vmatpush3.msk.msra.mxu1 %vm151_vm2, %v7782_v24  ;;  %7386 = vmatprep.mubr.msk.f32.mxu1 %vm7585_vm0, %v7583_v4 }
 0x3d9   :  { %7394 = vmatprep.subr.mxu1 %v7583_v4 }
 0x3db   :  { %7387 = vmatmul.mubr.f32.vlgmr.msra.gmra.mxu1 %v7652_v17 }
 0x3dc   :  { %7396 = vmatprep.mubr.msk.f32.mxu1 %vm7585_vm0, %v7583_v4 }
 0x47f   :  { %v3713_v41 = vpop.f32.mrf.mxu0 }
 0x481   :  { %v7333_v47 = vpop.f32.mrf.mxu0 }
 0x483   :  { %v3863_v48 = vpop.f32.mrf.mxu0 }
 0x485   :  { %v7343_v20 = vpop.f32.mrf.mxu0 }
 0x487   :  { %v3789_v49 = vpop.f32.mrf.mxu1 }
 0x488   :  { %v3790_v62 = vadd.f32 %v3789_v49, %v3713_v41  ;;  %v4087_v41 = vadd.f32 %v8126_v23, %v8104_v5  ;;  %v191_v49 = vadd.f32 %v190_v43, %v189_v22 }
 0x489   :  { %v7338_v54 = vpop.f32.mrf.mxu1  ;;  %v4011_v46 = vpop.f32.mrf.mxu0 }
 0x48a   :  { %v3864_v55 = vadd.f32 %v3863_v48, %v3790_v62 }
 0x48b   :  { %v3937_v24 = vpop.f32.mrf.mxu1  ;;  %v7353_v59 = vpop.f32.mrf.mxu0 }
 0x48c   :  { %v3938_v56 = vadd.f32 %v3937_v24, %v3864_v55  ;;  %v192_v59 = vrot.slane %v191_v49, 1 }
 0x48d   :  { %v7348_v61 = vpop.f32.mrf.mxu1  ;;  %v4172_v63 = vpop.f32.mrf.mxu0 }
 0x48e   :  { %v4012_v12 = vadd.f32 %v4011_v46, %v3938_v56  ;;  %v193_v23 = vadd.f32 %v192_v59, %v191_v49 }
 0x48f   :  { %v4083_v3 = vpop.f32.mrf.mxu1  ;;  %v7363_v8 = vpop.f32.mrf.mxu0 }
 0x490   :  { %v4084_v9 = vadd.f32 %v4083_v3, %v4012_v12 }
 0x491   :  { %v7358_v11 = vpop.f32.mrf.mxu1  ;;  %v4322_v15 = vpop.f32.mrf.mxu0 }
 0x492   :  { %7563 = vlog2.f32 %v4084_v9 }
 0x493   :  { %v4248_v1 = vpop.f32.mrf.mxu1  ;;  %v7373_v19 = vpop.f32.mrf.mxu0 }
 0x494   :  { %v4249_v26 = vadd.f32 %v4248_v1, %v4172_v63 }
 0x495   :  { %v7368_v27 = vpop.f32.mrf.mxu1  ;;  %v4470_v51 = vpop.f32.mrf.mxu0 }
 0x496   :  { %v4323_v38 = vadd.f32 %v4322_v15, %v4249_v26 }
 0x497   :  { %v4396_v28 = vpop.f32.mrf.mxu1  ;;  %v7383_v42 = vpop.f32.mrf.mxu0 }
 0x498   :  { %v4397_v10 = vadd.f32 %v4396_v28, %v4323_v38  ;;  %v5140_v28 = vsub.f32 %v5030_v40, %v5030_v40 }
 0x499   :  { %v7378_v16 = vpop.f32.mrf.mxu1 }
 0x49a   :  { %v4471_v33 = vadd.f32 %v4470_v51, %v4397_v10  ;;  %v5141_v30 = vand.u32 4294901760, %v5140_v28 }
 0x49b   :  { %v4542_v34 = vpop.f32.mrf.mxu1 }
 0x49c   :  { %v4543_v35 = vadd.f32 %v4542_v34, %v4471_v33  ;;  %v5142_v16 = vsub.f32 %v5140_v28, %v5141_v30 }
 0x49d   :  { %v7388_v39 = vpop.f32.mrf.mxu1 }
 0x49e   :  { %v4546_v45 = vmul.f32 %v7802_v36, %v4543_v35  ;;  %v5143_v22 = vand.u32 4294901760, %v5142_v16 }
 0x49f   :  { %v7564_v2 = vpop.eup %7563 }
 0x4a0   :  { %v4089_v47 = vmul.f32 0.6931472, %v7564_v2  ;;  %v4547_v48 = vsel %vm151_vm2, %v4546_v45, 0.0 }
 0x4a1   :  { %v4548_v20 = vrot.slane %v4547_v48, 4 }
 0x4a2   :  { %v4090_v62 = vadd.f32 %v4089_v47, %v4087_v41 }
 0x4a3   :  { %v4549_v54 = vadd.f32 %v4548_v20, %v4547_v48  ;;  %v8277_v48 = vld [vmem:[%s8417_s0 + $0x30] sm:$0x3f] }
 0x4a4   :  { %v8205_v46 = vsel %vm4095_vm1, %v4090_v62, %v8116_v0 }
 0x4a5   :  { %v4560_v55 = vsel %vm151_vm2, %v8205_v46, -inf  ;;  %v4550_v24 = vrot.slane %v4549_v54, 2 }
 0x4a6   :  { %v4561_v56 = vrot.slane %v4560_v55, 4 }
 0x4a7   :  { %v4551_v61 = vadd.f32 %v4550_v24, %v4549_v54 }
 0x4a8   :  { %v4562_v63 = vmax.f32 %v4560_v55, %v4561_v56  ;;  %v149_v55 = vmul.f32 %v7813_v44, %v8277_v48 }
 0x4a9   :  { %v4552_v5 = vrot.slane %v4551_v61, 1 }
 0x4aa   :  { %v4563_v12 = vrot.slane %v4562_v63, 2 }
 0x4ab   :  { %v4553_v14 = vadd.f32 %v4552_v5, %v4551_v61  ;;  %v194_v5 = vsel %vm151_vm2, %v149_v55, 0.0 }
 0x4ac   :  { %v4564_v3 = vmax.f32 %v4562_v63, %v4563_v12 }
 0x4ad   :  { %v4554_v8 = vadd.f32 %v4553_v14, %v193_v23 }
 0x4ae   :  { %v4565_v9 = vrot.slane %v4564_v3, 1 }
 0x4af   :  { %v4555_v11 = vmul.f32 %v8123_v13, %v4554_v8 }
 0x4b0   :  { %v8210_v15 = vmax.f32 %v4564_v3, %v4565_v9  ;;  %v195_v9 = vrot.slane %v194_v5, 4 }
 0x4b1   :  { %v4557_v0 = vrot.slane %v4555_v11, 4 }
 0x4b2   :  { %v4567_v31 = vsub.f32 %v8205_v46, %v8210_v15 }
 0x4b3   :  { %v8215_v1 = vadd.f32 %v4557_v0, %v8131_v29 }
 0x4b4   :  { %v4568_v19 = vmul.f32 1.442695, %v4567_v31 }
 0x4b6   :  { %7565 = vpow2.f32 %v4568_v19 }
 0x4c3   :  { %v7566_v26 = vpop.eup %7565 }
 0x4c4   :  { %v4571_v27 = vsel %vm151_vm2, %v7566_v26, 0  ;;  %v5025_v26 = vsub.s32 5, %v7631_v7 }
 0x4c5   :  { %v4604_v51 = vand.u32 4294901760, %v4571_v27 }
 0x4c7   :  { %7390 = vmatpush3.msra.mxu0 %v4604_v51  ;;  %v4681_v38 = vsub.f32 %v4571_v27, %v4604_v51 }
 0x4c8   :  { %7392 = vmatmul.mubr.f32.vlgmr.msra.gmra.mxu0 %v7857_v57  ;;  %7399 = vmatprep.subr.mxu0 %v7583_v4 }
 0x4c9   :  { %7400 = vmatpush3.msra.mxu0 %v4681_v38  ;;  %7401 = vmatprep.mubr.msk.f32.mxu0 %vm7585_vm0, %v7583_v4  ;;  %v4682_v29 = vand.u32 4294901760, %v4681_v38 }
 0x4ca   :  { %7409 = vmatprep.subr.mxu0 %v7583_v4 }
 0x4cb   :  { %v4683_v42 = vsub.f32 %v4681_v38, %v4682_v29 }
 0x4cc   :  { %7402 = vmatmul.mubr.f32.vlgmr.msra.gmra.mxu0 %v7849_v52 }
 0x4cd   :  { %7410 = vmatpush3.msra.mxu0 %v4682_v29  ;;  %v4684_v10 = vand.u32 4294901760, %v4683_v42  ;;  %7411 = vmatprep.mubr.msk.f32.mxu0 %vm7585_vm0, %v7583_v4 }
 0x4ce   :  { %7419 = vmatprep.subr.mxu0 %v7583_v4 }
 0x4cf   :  { %7395 = vmatpush3.msra.mxu1 %v4684_v10 }
 0x4d0   :  { %7397 = vmatmul.mubr.f32.vlgmr.msra.gmra.mxu1 %v7843_v50  ;;  %7404 = vmatprep.subr.mxu1 %v7583_v4 }
 0x4d1   :  { %7405 = vmatpush3.msra.mxu1 %v4604_v51  ;;  %7406 = vmatprep.mubr.msk.f32.mxu1 %vm7585_vm0, %v7583_v4 }
 0x4d2   :  { %7414 = vmatprep.subr.mxu1 %v7583_v4  ;;  %7412 = vmatmul.mubr.f32.vlgmr.msra.gmra.mxu0 %v7843_v50 }
 0x4d3   :  { %7420 = vmatpush3.msk.msra.mxu0 %vm151_vm2, %v7802_v36  ;;  %7421 = vmatprep.mubr.msk.f32.mxu0 %vm7585_vm0, %v7583_v4 }
 0x4d4   :  { %7407 = vmatmul.mubr.f32.vlgmr.msra.gmra.mxu1 %v7852_v53  ;;  %7429 = vmatprep.subr.mxu0 %v7583_v4 }
 0x4d5   :  { %7415 = vmatpush3.msra.mxu1 %v4604_v51  ;;  %7416 = vmatprep.mubr.msk.f32.mxu1 %vm7585_vm0, %v7583_v4  ;;  %v196_v51 = vadd.f32 %v195_v9, %v194_v5 }
 0x4d6   :  { %7422 = vmatmul.mubr.f32.vlgmr.msra.gmra.mxu0 %v7682_v37  ;;  %7424 = vmatprep.subr.mxu1 %v7583_v4 }
 0x4d7   :  { %7430 = vmatpush3.msra.mxu0 %v5140_v28  ;;  %7431 = vmatprep.mubr.msk.f32.mxu0 %vm7585_vm0, %v7583_v4  ;;  %v5026_v28 = vrot.slane %v7940_v58, %v5025_v26  ;;  %v197_v10 = vrot.slane %v196_v51, 2 }
 0x4d8   :  { %7417 = vmatmul.mubr.f32.vlgmr.msra.gmra.mxu1 %v7843_v50  ;;  %7439 = vmatprep.subr.mxu0 %v7583_v4 }
 0x4d9   :  { %7425 = vmatpush3.msra.mxu1 %v5143_v22  ;;  %7426 = vmatprep.mubr.msk.f32.mxu1 %vm7585_vm0, %v7583_v4  ;;  %v5019_v22 = vadd.f32 %v8210_v15, %v8193_v60  ;;  %vm5027_vm3 = vcmp.eq.s32.totalorder %v5026_v28, 1 }
 0x4da   :  { %7432 = vmatmul.mubr.f32.vlgmr.msra.gmra.mxu0 %v7660_v21  ;;  %7434 = vmatprep.subr.mxu1 %v7583_v4 }
 0x4db   :  { %7440 = vmatpush3.msra.mxu0 %v5141_v30  ;;  %7441 = vmatprep.mubr.msk.f32.mxu0 %vm7585_vm0, %v7583_v4 }
 0x4dc   :  { %7427 = vmatmul.mubr.f32.vlgmr.msra.gmra.mxu1 %v7652_v17  ;;  %7449 = vmatprep.subr.mxu0 %v7583_v4 }
 0x4dd   :  { %7435 = vmatpush3.msk.msra.mxu1 %vm151_vm2, %v7802_v36  ;;  %7436 = vmatprep.mubr.msk.f32.mxu1 %vm7585_vm0, %v7583_v4 }
 0x4de   :  { %7442 = vmatmul.mubr.f32.vlgmr.msra.gmra.mxu0 %v7652_v17  ;;  %7444 = vmatprep.subr.mxu1 %v7583_v4 }
 0x4df   :  { %7451 = vmatprep.mubr.msk.f32.mxu0 %vm7585_vm0, %v7583_v4 }
 0x4e0   :  { %7437 = vmatmul.mubr.f32.vlgmr.msra.gmra.mxu1 %v7665_v25 }
 0x4e1   :  { %7445 = vmatpush3.msk.msra.mxu1 %vm151_vm2, %v7802_v36  ;;  %7446 = vmatprep.mubr.msk.f32.mxu1 %vm7585_vm0, %v7583_v4 }
 0x4e2   :  { %7454 = vmatprep.subr.mxu1 %v7583_v4 }
 0x4e4   :  { %7447 = vmatmul.mubr.f32.vlgmr.msra.gmra.mxu1 %v7652_v17 }
 0x4e5   :  { %7456 = vmatprep.mubr.msk.f32.mxu1 %vm7585_vm0, %v7583_v4 }
 0x588   :  { %v4645_v33 = vpop.f32.mrf.mxu0 }
 0x58a   :  { %v7393_v34 = vpop.f32.mrf.mxu0 }
 0x58c   :  { %v4795_v35 = vpop.f32.mrf.mxu0 }
 0x58e   :  { %v7403_v6 = vpop.f32.mrf.mxu0 }
 0x58f   :  { %v198_v6 = vadd.f32 %v197_v10, %v196_v51 }
 0x590   :  { %v4721_v39 = vpop.f32.mrf.mxu1 }
 0x591   :  { %v4722_v43 = vadd.f32 %v4721_v39, %v4645_v33 }
 0x592   :  { %v7398_v45 = vpop.f32.mrf.mxu1  ;;  %v4943_v2 = vpop.f32.mrf.mxu0 }
 0x593   :  { %v4796_v41 = vadd.f32 %v4795_v35, %v4722_v43 }
 0x594   :  { %v4869_v36 = vpop.f32.mrf.mxu1  ;;  %v7413_v47 = vpop.f32.mrf.mxu0 }
 0x595   :  { %v4870_v20 = vadd.f32 %v4869_v36, %v4796_v41  ;;  %v199_v36 = vrot.slane %v198_v6, 1 }
 0x596   :  { %v7408_v49 = vpop.f32.mrf.mxu1  ;;  %v5104_v62 = vpop.f32.mrf.mxu0 }
 0x597   :  { %v4944_v54 = vadd.f32 %v4943_v2, %v4870_v20  ;;  %v200_v15 = vadd.f32 %v199_v36, %v198_v6 }
 0x598   :  { %v5015_v24 = vpop.f32.mrf.mxu1  ;;  %v7423_v59 = vpop.f32.mrf.mxu0 }
 0x599   :  { %v5016_v56 = vadd.f32 %v5015_v24, %v4944_v54 }
 0x59a   :  { %v7418_v61 = vpop.f32.mrf.mxu1  ;;  %v5254_v63 = vpop.f32.mrf.mxu0 }
 0x59b   :  { %7567 = vlog2.f32 %v5016_v56 }
 0x59c   :  { %v5180_v23 = vpop.f32.mrf.mxu1  ;;  %v7433_v12 = vpop.f32.mrf.mxu0 }
 0x59d   :  { %v5181_v14 = vadd.f32 %v5180_v23, %v5104_v62 }
 0x59e   :  { %v7428_v3 = vpop.f32.mrf.mxu1  ;;  %v5402_v8 = vpop.f32.mrf.mxu0 }
 0x59f   :  { %v5255_v11 = vadd.f32 %v5254_v63, %v5181_v14 }
 0x5a0   :  { %v5328_v0 = vpop.f32.mrf.mxu1  ;;  %v7443_v31 = vpop.f32.mrf.mxu0 }
 0x5a1   :  { %v5329_v19 = vadd.f32 %v5328_v0, %v5255_v11 }
 0x5a2   :  { %v7438_v27 = vpop.f32.mrf.mxu1 }
 0x5a3   :  { %v5403_v40 = vadd.f32 %v5402_v8, %v5329_v19  ;;  %v5962_v8 = vsel %vm151_vm2, %v7813_v44, 0 }
 0x5a4   :  { %v5474_v38 = vpop.f32.mrf.mxu1  ;;  %v6072_v11 = vsub.f32 %v5962_v8, %v5962_v8 }
 0x5a5   :  { %v5475_v29 = vadd.f32 %v5474_v38, %v5403_v40 }
 0x5a6   :  { %v7448_v42 = vpop.f32.mrf.mxu1  ;;  %v6073_v19 = vand.u32 4294901760, %v6072_v11 }
 0x5a7   :  { %v5478_v30 = vmul.f32 %v7813_v44, %v5475_v29 }
 0x5a8   :  { %v7568_v16 = vpop.eup %7567  ;;  %v6074_v26 = vsub.f32 %v6072_v11, %v6073_v19 }
 0x5a9   :  { %v5021_v33 = vmul.f32 0.6931472, %v7568_v16  ;;  %v5479_v34 = vsel %vm151_vm2, %v5478_v30, 0.0  ;;  %v8361_v30 = vld [vmem:[%s8417_s0 + $0x38] sm:$0x3f] }
 0x5aa   :  { %v5480_v35 = vrot.slane %v5479_v34, 4  ;;  %v6075_v27 = vand.u32 4294901760, %v6074_v26 }
 0x5ab   :  { %v5022_v39 = vadd.f32 %v5021_v33, %v5019_v22 }
 0x5ac   :  { %v5481_v43 = vadd.f32 %v5480_v35, %v5479_v34  ;;  %v150_v34 = vmul.f32 %v7794_v32, %v8361_v30 }
 0x5ad   :  { %v8289_v45 = vsel %vm5027_vm3, %v5022_v39, %v8205_v46 }
 0x5ae   :  { %v5492_v2 = vsel %vm151_vm2, %v8289_v45, -inf  ;;  %v5482_v41 = vrot.slane %v5481_v43, 2 }
 0x5af   :  { %v5493_v47 = vrot.slane %v5492_v2, 4 }
 0x5b0   :  { %v5483_v20 = vadd.f32 %v5482_v41, %v5481_v43  ;;  %v201_v41 = vsel %vm151_vm2, %v150_v34, 0.0 }
 0x5b1   :  { %v5494_v49 = vmax.f32 %v5492_v2, %v5493_v47 }
 0x5b2   :  { %v5484_v60 = vrot.slane %v5483_v20, 1 }
 0x5b3   :  { %v5495_v62 = vrot.slane %v5494_v49, 2 }
 0x5b4   :  { %v5485_v54 = vadd.f32 %v5484_v60, %v5483_v20 }
 0x5b5   :  { %v5496_v55 = vmax.f32 %v5494_v49, %v5495_v62 }
 0x5b6   :  { %v5486_v24 = vadd.f32 %v5485_v54, %v200_v15  ;;  %v202_v15 = vrot.slane %v201_v41, 4 }
 0x5b7   :  { %v5497_v59 = vrot.slane %v5496_v55, 1 }
 0x5b8   :  { %v5487_v56 = vmul.f32 %v8123_v13, %v5486_v24 }
 0x5b9   :  { %v8294_v61 = vmax.f32 %v5496_v55, %v5497_v59  ;;  %v5957_v59 = vsub.s32 6, %v7631_v7 }
 0x5ba   :  { %v5489_v46 = vrot.slane %v5487_v56, 5 }
 0x5bb   :  { %v5499_v63 = vsub.f32 %v8289_v45, %v8294_v61 }
 0x5bc   :  { %v8299_v5 = vadd.f32 %v5489_v46, %v8215_v1  ;;  %v203_v46 = vadd.f32 %v202_v15, %v201_v41 }
 0x5bd   :  { %v5500_v23 = vmul.f32 1.442695, %v5499_v63 }
 0x5be   :  { %v204_v8 = vrot.slane %v203_v46, 2 }
 0x5bf   :  { %7569 = vpow2.f32 %v5500_v23 }
 0x5c0   :  { %v205_v26 = vadd.f32 %v204_v8, %v203_v46 }
 0x5cc   :  { %v7570_v12 = vpop.eup %7569 }
 0x5cd   :  { %v5503_v14 = vsel %vm151_vm2, %v7570_v12, 0 }
 0x5ce   :  { %v5536_v3 = vand.u32 4294901760, %v5503_v14 }
 0x5d0   :  { %7450 = vmatpush3.msra.mxu0 %v5536_v3  ;;  %v5613_v9 = vsub.f32 %v5503_v14, %v5536_v3  ;;  %v5958_v14 = vrot.slane %v7940_v58, %v5957_v59 }
 0x5d1   :  { %7452 = vmatmul.mubr.f32.vlgmr.msra.gmra.mxu0 %v7857_v57  ;;  %7459 = vmatprep.subr.mxu0 %v7583_v4 }
 0x5d2   :  { %7460 = vmatpush3.msra.mxu0 %v5613_v9  ;;  %7461 = vmatprep.mubr.msk.f32.mxu0 %vm7585_vm0, %v7583_v4  ;;  %v5614_v1 = vand.u32 4294901760, %v5613_v9  ;;  %vm5959_vm4 = vcmp.eq.s32.totalorder %v5958_v14, 1 }
 0x5d3   :  { %7469 = vmatprep.subr.mxu0 %v7583_v4 }
 0x5d4   :  { %v5615_v0 = vsub.f32 %v5613_v9, %v5614_v1 }
 0x5d5   :  { %7462 = vmatmul.mubr.f32.vlgmr.msra.gmra.mxu0 %v7849_v52 }
 0x5d6   :  { %7470 = vmatpush3.msra.mxu0 %v5614_v1  ;;  %v5616_v31 = vand.u32 4294901760, %v5615_v0  ;;  %7471 = vmatprep.mubr.msk.f32.mxu0 %vm7585_vm0, %v7583_v4 }
 0x5d7   :  { %7479 = vmatprep.subr.mxu0 %v7583_v4 }
 0x5d8   :  { %7455 = vmatpush3.msra.mxu1 %v5616_v31 }
 0x5d9   :  { %7457 = vmatmul.mubr.f32.vlgmr.msra.gmra.mxu1 %v7843_v50  ;;  %7464 = vmatprep.subr.mxu1 %v7583_v4 }
 0x5da   :  { %7465 = vmatpush3.msra.mxu1 %v5536_v3  ;;  %7466 = vmatprep.mubr.msk.f32.mxu1 %vm7585_vm0, %v7583_v4 }
 0x5db   :  { %7474 = vmatprep.subr.mxu1 %v7583_v4  ;;  %7472 = vmatmul.mubr.f32.vlgmr.msra.gmra.mxu0 %v7843_v50 }
 0x5dc   :  { %7480 = vmatpush3.msk.msra.mxu0 %vm151_vm2, %v7813_v44  ;;  %7481 = vmatprep.mubr.msk.f32.mxu0 %vm7585_vm0, %v7583_v4 }
 0x5dd   :  { %7467 = vmatmul.mubr.f32.vlgmr.msra.gmra.mxu1 %v7852_v53  ;;  %7489 = vmatprep.subr.mxu0 %v7583_v4 }
 0x5de   :  { %7475 = vmatpush3.msra.mxu1 %v5536_v3  ;;  %7476 = vmatprep.mubr.msk.f32.mxu1 %vm7585_vm0, %v7583_v4 }
 0x5df   :  { %7482 = vmatmul.mubr.f32.vlgmr.msra.gmra.mxu0 %v7682_v37  ;;  %7484 = vmatprep.subr.mxu1 %v7583_v4 }
 0x5e0   :  { %7490 = vmatpush3.msra.mxu0 %v6072_v11  ;;  %7491 = vmatprep.mubr.msk.f32.mxu0 %vm7585_vm0, %v7583_v4  ;;  %v5951_v11 = vadd.f32 %v8294_v61, %v8277_v48 }
 0x5e1   :  { %7477 = vmatmul.mubr.f32.vlgmr.msra.gmra.mxu1 %v7843_v50  ;;  %7499 = vmatprep.subr.mxu0 %v7583_v4 }
 0x5e2   :  { %7485 = vmatpush3.msra.mxu1 %v6075_v27  ;;  %7486 = vmatprep.mubr.msk.f32.mxu1 %vm7585_vm0, %v7583_v4 }
 0x5e3   :  { %7492 = vmatmul.mubr.f32.vlgmr.msra.gmra.mxu0 %v7660_v21  ;;  %7494 = vmatprep.subr.mxu1 %v7583_v4 }
 0x5e4   :  { %7500 = vmatpush3.msra.mxu0 %v6073_v19  ;;  %7501 = vmatprep.mubr.msk.f32.mxu0 %vm7585_vm0, %v7583_v4 }
 0x5e5   :  { %7487 = vmatmul.mubr.f32.vlgmr.msra.gmra.mxu1 %v7652_v17  ;;  %7509 = vmatprep.subr.mxu0 %v7583_v4 }
 0x5e6   :  { %7495 = vmatpush3.msk.msra.mxu1 %vm151_vm2, %v7813_v44  ;;  %7496 = vmatprep.mubr.msk.f32.mxu1 %vm7585_vm0, %v7583_v4 }
 0x5e7   :  { %7502 = vmatmul.mubr.f32.vlgmr.msra.gmra.mxu0 %v7652_v17  ;;  %7504 = vmatprep.subr.mxu1 %v7583_v4 }
 0x5e8   :  { %7511 = vmatprep.mubr.msk.f32.mxu0 %vm7585_vm0, %v7583_v4 }
 0x5e9   :  { %7497 = vmatmul.mubr.f32.vlgmr.msra.gmra.mxu1 %v7665_v25 }
 0x5ea   :  { %7505 = vmatpush3.msk.msra.mxu1 %vm151_vm2, %v7813_v44  ;;  %7506 = vmatprep.mubr.msk.f32.mxu1 %vm7585_vm0, %v7583_v4 }
 0x5eb   :  { %7514 = vmatprep.subr.mxu1 %v7583_v4 }
 0x5ed   :  { %7507 = vmatmul.mubr.f32.vlgmr.msra.gmra.mxu1 %v7652_v17 }
 0x5ee   :  { %7516 = vmatprep.mubr.msk.f32.mxu1 %vm7585_vm0, %v7583_v4 }
 0x691   :  { %v5577_v21 = vpop.f32.mrf.mxu0 }
 0x693   :  { %v7453_v37 = vpop.f32.mrf.mxu0 }
 0x695   :  { %v5727_v51 = vpop.f32.mrf.mxu0 }
 0x697   :  { %v7463_v40 = vpop.f32.mrf.mxu0 }
 0x699   :  { %v5653_v38 = vpop.f32.mrf.mxu1 }
 0x69a   :  { %v5654_v29 = vadd.f32 %v5653_v38, %v5577_v21 }
 0x69b   :  { %v7458_v25 = vpop.f32.mrf.mxu1  ;;  %v5875_v28 = vpop.f32.mrf.mxu0 }
 0x69c   :  { %v5728_v42 = vadd.f32 %v5727_v51, %v5654_v29 }
 0x69d   :  { %v5801_v44 = vpop.f32.mrf.mxu1  ;;  %v7473_v10 = vpop.f32.mrf.mxu0 }
 0x69e   :  { %v5802_v17 = vadd.f32 %v5801_v44, %v5728_v42 }
 0x69f   :  { %v7468_v16 = vpop.f32.mrf.mxu1  ;;  %v6036_v22 = vpop.f32.mrf.mxu0 }
 0x6a0   :  { %v5876_v33 = vadd.f32 %v5875_v28, %v5802_v17 }
 0x6a1   :  { %v5947_v35 = vpop.f32.mrf.mxu1  ;;  %v7483_v6 = vpop.f32.mrf.mxu0 }
 0x6a2   :  { %v5948_v39 = vadd.f32 %v5947_v35, %v5876_v33 }
 0x6a3   :  { %v7478_v43 = vpop.f32.mrf.mxu1  ;;  %v6186_v2 = vpop.f32.mrf.mxu0 }
 0x6a4   :  { %7571 = vlog2.f32 %v5948_v39 }
 0x6a5   :  { %v6112_v36 = vpop.f32.mrf.mxu1  ;;  %v7493_v47 = vpop.f32.mrf.mxu0 }
 0x6a6   :  { %v6113_v20 = vadd.f32 %v6112_v36, %v6036_v22 }
 0x6a7   :  { %v7488_v49 = vpop.f32.mrf.mxu1  ;;  %v6334_v60 = vpop.f32.mrf.mxu0 }
 0x6a8   :  { %v6187_v62 = vadd.f32 %v6186_v2, %v6113_v20 }
 0x6a9   :  { %v6260_v54 = vpop.f32.mrf.mxu1  ;;  %v7503_v55 = vpop.f32.mrf.mxu0 }
 0x6aa   :  { %v6261_v24 = vadd.f32 %v6260_v54, %v6187_v62 }
 0x6ab   :  { %v7498_v56 = vpop.f32.mrf.mxu1 }
 0x6ac   :  { %v6335_v63 = vadd.f32 %v6334_v60, %v6261_v24 }
 0x6ad   :  { %v6406_v23 = vpop.f32.mrf.mxu1 }
 0x6ae   :  { %v6407_v12 = vadd.f32 %v6406_v23, %v6335_v63 }
 0x6af   :  { %v7508_v3 = vpop.f32.mrf.mxu1 }
 0x6b0   :  { %v6410_v9 = vmul.f32 %v7794_v32, %v6407_v12  ;;  %v206_v32 = vrot.slane %v205_v26, 1 }
 0x6b1   :  { %v7572_v1 = vpop.eup %7571 }
 0x6b2   :  { %v5953_v0 = vmul.f32 0.6931472, %v7572_v1  ;;  %v6411_v31 = vsel %vm151_vm2, %v6410_v9, 0.0  ;;  %v207_v61 = vadd.f32 %v206_v32, %v205_v26 }
 0x6b3   :  { %v6412_v19 = vrot.slane %v6411_v31, 4 }
 0x6b4   :  { %v5954_v27 = vadd.f32 %v5953_v0, %v5951_v11 }
 0x6b5   :  { %v6413_v21 = vadd.f32 %v6412_v19, %v6411_v31 }
 0x6b6   :  { %v8373_v37 = vsel %vm5959_vm4, %v5954_v27, %v8289_v45 }
 0x6b7   :  { %v6424_v51 = vsel %vm151_vm2, %v8373_v37, -inf  ;;  %v6414_v40 = vrot.slane %v6413_v21, 2 }
 0x6b8   :  { %v6425_v38 = vrot.slane %v6424_v51, 4 }
 0x6b9   :  { %v6415_v29 = vadd.f32 %v6414_v40, %v6413_v21 }
 0x6ba   :  { %v6426_v25 = vmax.f32 %v6424_v51, %v6425_v38 }
 0x6bb   :  { %v6416_v48 = vrot.slane %v6415_v29, 1 }
 0x6bc   :  { %v6427_v28 = vrot.slane %v6426_v25, 2 }
 0x6bd   :  { %v6417_v42 = vadd.f32 %v6416_v48, %v6415_v29 }
 0x6be   :  { %v6428_v44 = vmax.f32 %v6426_v25, %v6427_v28 }
 0x6bf   :  { %v6418_v10 = vadd.f32 %v6417_v42, %v207_v61 }
 0x6c0   :  { %v6429_v17 = vrot.slane %v6428_v44, 1 }
 0x6c1   :  { %v6419_v16 = vmul.f32 %v8123_v13, %v6418_v10 }
 0x6c2   :  { %v6430_v22 = vmax.f32 %v6428_v44, %v6429_v17 }
 0x6c3   :  { %v6421_v45 = vrot.slane %v6419_v16, 6 }
 0x6c4   :  { %v6431_v33 = vsub.f32 %v8373_v37, %v6430_v22  ;;  %v6883_v12 = vadd.f32 %v6430_v22, %v8361_v30 }
 0x6c5   :  { %v8380_v34 = vadd.f32 %v6421_v45, %v8299_v5 }
 0x6c6   :  { %v6432_v35 = vmul.f32 1.442695, %v6431_v33 }
 0x6c8   :  { %7573 = vpow2.f32 %v6432_v35 }
 0x6d5   :  { %v7574_v6 = vpop.eup %7573 }
 0x6d6   :  { %v6435_v39 = vsel %vm151_vm2, %v7574_v6, 0 }
 0x6d7   :  { %v6468_v43 = vand.u32 4294901760, %v6435_v39 }
 0x6d9   :  { %7510 = vmatpush3.msra.mxu0 %v6468_v43  ;;  %v6545_v2 = vsub.f32 %v6435_v39, %v6468_v43 }
 0x6da   :  { %7512 = vmatmul.mubr.f32.vlgmr.msra.gmra.mxu0 %v7857_v57  ;;  %7519 = vmatprep.subr.mxu0 %v7583_v4 }
 0x6db   :  { %7520 = vmatpush3.msra.mxu0 %v6545_v2  ;;  %7521 = vmatprep.mubr.msk.f32.mxu0 %vm7585_vm0, %v7583_v4  ;;  %v6546_v13 = vand.u32 4294901760, %v6545_v2 }
 0x6dc   :  { %7529 = vmatprep.subr.mxu0 %v7583_v4 }
 0x6dd   :  { %v6547_v5 = vsub.f32 %v6545_v2, %v6546_v13 }
 0x6de   :  { %7522 = vmatmul.mubr.f32.vlgmr.msra.gmra.mxu0 %v7849_v52 }
 0x6df   :  { %7530 = vmatpush3.msra.mxu0 %v6546_v13  ;;  %v6548_v41 = vand.u32 4294901760, %v6547_v5  ;;  %7531 = vmatprep.mubr.msk.f32.mxu0 %vm7585_vm0, %v7583_v4 }
 0x6e1   :  { %7515 = vmatpush3.msra.mxu1 %v6548_v41 }
 0x6e2   :  { %7517 = vmatmul.mubr.f32.vlgmr.msra.gmra.mxu1 %v7843_v50  ;;  %7524 = vmatprep.subr.mxu1 %v7583_v4 }
 0x6e3   :  { %7525 = vmatpush3.msra.mxu1 %v6468_v43  ;;  %7526 = vmatprep.mubr.msk.f32.mxu1 %vm7585_vm0, %v7583_v4 }
 0x6e4   :  { %7534 = vmatprep.subr.mxu1 %v7583_v4  ;;  %7532 = vmatmul.mubr.f32.vlgmr.msra.gmra.mxu0 %v7843_v50 }
 0x6e6   :  { %7527 = vmatmul.mubr.f32.vlgmr.msra.gmra.mxu1 %v7852_v53 }
 0x6e7   :  { %7535 = vmatpush3.msra.mxu1 %v6468_v43  ;;  %7536 = vmatprep.mubr.msk.f32.mxu1 %vm7585_vm0, %v7583_v4  ;;  %v6889_v4 = vsub.s32 7, %v7631_v7 }
 0x6ea   :  { %7537 = vmatmul.mubr.f32.vlgmr.msra.gmra.mxu1 %v7843_v50  ;;  %v6890_v50 = vrot.slane %v7940_v58, %v6889_v4 }
 0x6ec   :  { %vm6891_vm0 = vcmp.eq.s32.totalorder %v6890_v50, 1 }
 0x79a   :  { %v6509_v52 = vpop.f32.mrf.mxu0 }
 0x79c   :  { %v7513_v57 = vpop.f32.mrf.mxu0 }
 0x79e   :  { %v6659_v36 = vpop.f32.mrf.mxu0 }
 0x7a0   :  { %v7523_v47 = vpop.f32.mrf.mxu0 }
 0x7a2   :  { %v6585_v20 = vpop.f32.mrf.mxu1 }
 0x7a3   :  { %v6586_v49 = vadd.f32 %v6585_v20, %v6509_v52 }
 0x7a4   :  { %v7518_v60 = vpop.f32.mrf.mxu1  ;;  %v6807_v15 = vpop.f32.mrf.mxu0 }
 0x7a5   :  { %v6660_v62 = vadd.f32 %v6659_v36, %v6586_v49 }
 0x7a6   :  { %v6733_v54 = vpop.f32.mrf.mxu1  ;;  %v7533_v55 = vpop.f32.mrf.mxu0 }
 0x7a7   :  { %v6734_v24 = vadd.f32 %v6733_v54, %v6660_v62 }
 0x7a8   :  { %v7528_v59 = vpop.f32.mrf.mxu1 }
 0x7a9   :  { %v6808_v53 = vadd.f32 %v6807_v15, %v6734_v24 }
 0x7aa   :  { %v6879_v56 = vpop.f32.mrf.mxu1 }
 0x7ab   :  { %v6880_v46 = vadd.f32 %v6879_v56, %v6808_v53 }
 0x7ac   :  { %v7538_v63 = vpop.f32.mrf.mxu1 }
 0x7ad   :  { %7575 = vlog2.f32 %v6880_v46 }
 0x7ba   :  { %v7576_v23 = vpop.eup %7575 }
 0x7bb   :  { %v6885_v14 = vmul.f32 0.6931472, %v7576_v23 }
 0x7bd   :  { %v6886_v3 = vadd.f32 %v6885_v14, %v6883_v12 }
 0x7bf   :  { %v6892_v8 = vsel %vm6891_vm0, %v6886_v3, %v8373_v37 }
 0x7c0   :  { %v6893_v9 = vadd.f32 %v6892_v8, %v7834_v18 }
 0x7c2   :  { %v6894_v1 = vsel %vm151_vm2, %v6893_v9, -inf }
 0x7c3   :  { %v6895_v11 = vrot.slane %v6894_v1, 4 }
 0x7c5   :  { %v6896_v0 = vmax.f32 %v6894_v1, %v6895_v11 }
 0x7c7   :  { %v6897_v31 = vrot.slane %v6896_v0, 2 }
 0x7c9   :  { %v6898_v19 = vmax.f32 %v6896_v0, %v6897_v31 }
 0x7cb   :  { %v6899_v26 = vrot.slane %v6898_v19, 1 }
 0x7cd   :  { %v6900_v7 = vmax.f32 %v6898_v19, %v6899_v26 }
 0x7cf   :  { %v6901_v27 = vsub.f32 %v6893_v9, %v6900_v7 }
 0x7d1   :  { %v6902_v58 = vmul.f32 1.442695, %v6901_v27 }
 0x7d3   :  { %7577 = vpow2.f32 %v6902_v58 }
 0x7e0   :  { %v7578_v21 = vpop.eup %7577 }
 0x7e1   :  { %v6904_v30 = vsel %vm151_vm2, %v7578_v21, 0.0 }
 0x7e2   :  { %v6905_v51 = vrot.slane %v6904_v30, 4 }
 0x7e4   :  { %v6906_v40 = vadd.f32 %v6905_v51, %v6904_v30 }
 0x7e6   :  { %v6907_v32 = vrot.slane %v6906_v40, 2 }
 0x7e8   :  { %v6908_v37 = vadd.f32 %v6907_v32, %v6906_v40 }
 0x7ea   :  { %v6909_v38 = vrot.slane %v6908_v37, 1 }
 0x7ec   :  { %v6910_v18 = vadd.f32 %v6909_v38, %v6908_v37 }
 0x7ee   :  { %7579 = vlog2.f32 %v6910_v18 }
 0x7fb   :  { %v7580_v29 = vpop.eup %7579 }
 0x7fc   :  { %v6912_v25 = vmul.f32 0.6931472, %v7580_v29 }
 0x7fe   :  { %v6913_v48 = vadd.f32 %v6912_v25, %v6900_v7 }
 0x800   :  { %v6914_v61 = vsub.f32 %v6913_v48, %v8380_v34 }
 0x802   :  { %6915 = vst [vmem:[%s8418_s6 - $0x1] sm:$0x2] %v6914_v61 }

</bundles_post_ra>
